<compile_context>
chip_gen: v7x
topology: tpu7x:2x2x1
jax: 0.10.0
libtpu: 0.0.40
codegen_flags: <defaults>
</compile_context>

<pallas_src>
import functools

import jax
import jax.numpy as jnp
import numpy as np
from jax.experimental import pallas as pl
from jax.experimental.pallas import tpu as pltpu

NUM_LAYERS = 2  # the fused kernel below is specialized to num_layers=2


# ----------------------------------------------------------------------------
# Fused Pallas kernel: 2-layer LSTM + output Linear, single invocation
# ----------------------------------------------------------------------------
def _fused_lstm_kernel(x_ref, wih0_ref, b0_ref, wcat_ref, whh1_ref, b1_ref,
                       vw_ref, vb_ref,
                       pred_ref, h_n_ref, c_n_ref,
                       xp_scratch,
                       *, hidden_dim, seq_len, batch, target_size):
    H, T, B = hidden_dim, seq_len, batch
    in_dim = x_ref.shape[-1]

    # ---- Hoisted layer-0 input projection: ONE MXU pass for all timesteps,
    # bias folded in.  Staged in VMEM so the per-step access is a static-index
    # vector load (vld slot has slack) rather than in-register sublane selects.
    x2d = x_ref[...].reshape(B * T, in_dim)
    xproj = (jnp.dot(x2d, wih0_ref[...], preferred_element_type=jnp.float32)
             + b0_ref[...])                                    # (B*T, 4H)
    xp_scratch[...] = xproj.reshape(B, T, 4 * H)

    # Weights / biases loaded once and kept live across the whole recurrence.
    wcat = wcat_ref[...]      # (H, 8H): [:, :4H] = W_ih1^T, [:, 4H:] = W_hh0^T
    whh1 = whh1_ref[...]      # (H, 4H)
    b1 = jnp.broadcast_to(b1_ref[...], (B, 4 * H))  # hoisted out of the loop

    def cell(gates, c_prev):
        # Gate columns pre-permuted to (i, f, o, g): ONE sigmoid over 3H lanes
        # + ONE tanh over H lanes (half the EUP work of full-width sig + tanh).
        s = jax.nn.sigmoid(gates[:, :3 * H])
        g = jnp.tanh(gates[:, 3 * H:])
        c_new = s[:, H:2 * H] * c_prev + s[:, :H] * g
        h_new = s[:, 2 * H:3 * H] * jnp.tanh(c_new)
        return h_new, c_new

    zeros = jnp.zeros((B, H), jnp.float32)
    h0, c0, h1, c1 = zeros, zeros, zeros, zeros
    rec0 = jnp.zeros((B, 4 * H), jnp.float32)   # h0_{t-1} @ W_hh0^T (0 at t=0)

    outs = []   # per-step layer-1 hiddens carried in registers
    # T is small and static -> fully unrolled loop with constant time indices.
    for t in range(T):
        # Layer 0: recurrent term was precomputed by the previous step's
        # fused matmul (or is zero at t=0).
        gates0 = xp_scratch[:, t, :] + rec0
        h0, c0 = cell(gates0, c0)

        # Off the h0 critical path: depends only on h1_{t-1}.
        rec1 = jnp.dot(h1, whh1, preferred_element_type=jnp.float32)

        # Wavefront fusion: one (B,H)@(H,8H) matmul yields BOTH layer-1's
        # input contribution at step t and layer-0's recurrent term for t+1.
        fused = jnp.dot(h0, wcat, preferred_element_type=jnp.float32)  # (B,8H)
        gates1 = fused[:, :4 * H] + rec1 + b1
        h1, c1 = cell(gates1, c1)
        rec0 = fused[:, 4 * H:]

        outs.append(h1)

    # Final hidden / cell states, written ONCE (not per step).
    h_n_ref[0] = h0
    h_n_ref[1] = h1
    c_n_ref[0] = c0
    c_n_ref[1] = c1

    # ---- Epilogue: single stack of the register-carried hiddens (batch-major,
    # matching the (B, T) prediction layout).
    out_bth = jnp.stack(outs, axis=1)                          # (B, T, H)
    if target_size == 1:
        # VPU broadcast-multiply + cross-lane reduce: avoids a tail MXU
        # fill/drain for an N=1 column.  Lane-dense (B, T) store.
        vw = vw_ref[...].reshape(1, 1, H)
        pred_ref[...] = jnp.sum(out_bth * vw, axis=-1) + vb_ref[...]
    else:
        out2d = out_bth.reshape(B * T, H)
        pred_ref[...] = (jnp.dot(out2d, vw_ref[...],
                                 preferred_element_type=jnp.float32)
                         + vb_ref[...]).reshape(B, T, target_size)


# ----------------------------------------------------------------------------
# Wrapper (mirrors _RNNModule.forward(x, h=None)); wrap in jax.jit at call site
# ----------------------------------------------------------------------------
def rnn_module_forward(packed, x, hidden_dim, target_size):
    """Returns (predictions (B,T,target), (h_n, c_n)) with PyTorch semantics."""
    B, T, _ = x.shape
    kernel = functools.partial(_fused_lstm_kernel, hidden_dim=hidden_dim,
                               seq_len=T, batch=B, target_size=target_size)
    vmem = lambda: pl.BlockSpec(memory_space=pltpu.MemorySpace.VMEM)
    pred_shape = (B, T) if target_size == 1 else (B, T, target_size)

    preds, h_n, c_n = pl.pallas_call(
        kernel,
        out_shape=(
            jax.ShapeDtypeStruct(pred_shape, jnp.float32),
            jax.ShapeDtypeStruct((NUM_LAYERS, B, hidden_dim), jnp.float32),
            jax.ShapeDtypeStruct((NUM_LAYERS, B, hidden_dim), jnp.float32),
        ),
        in_specs=[vmem() for _ in range(8)],
        out_specs=(vmem(), vmem(), vmem()),
        scratch_shapes=[pltpu.VMEM((B, T, 4 * hidden_dim), jnp.float32)],
    )(x, packed["wih0_t"], packed["b0"], packed["w_cat"],
      packed["whh1_t"], packed["b1"], packed["vw"], packed["vb"])

    return preds.reshape(B, T, target_size), (h_n, c_n)


# ----------------------------------------------------------------------------
# Parameter packing for the kernel (done ONCE, outside jit):
#   * gate columns permuted from PyTorch (i,f,g,o) to (i,f,o,g),
#   * W_ih / W_hh transposed, biases folded (b_ih + b_hh),
#   * layer-1 input weight and layer-0 recurrent weight concatenated to (H,8H).
# ----------------------------------------------------------------------------
def pack_params(raw, hidden_dim, target_size):
    H = hidden_dim
    perm = np.concatenate([np.arange(0, H), np.arange(H, 2 * H),
                           np.arange(3 * H, 4 * H), np.arange(2 * H, 3 * H)])
    layers = []
    for lp in raw["lstm"]:
        layers.append({
            "wih_t": lp["w_ih"][perm].T,                       # (in, 4H)
            "whh_t": lp["w_hh"][perm].T,                       # (H, 4H)
            "bias": (lp["b_ih"] + lp["b_hh"])[perm].reshape(1, 4 * H),
        })
    l0, l1 = layers
    packed = {
        "wih0_t": l0["wih_t"],
        "b0": l0["bias"],
        "w_cat": jnp.concatenate([l1["wih_t"], l0["whh_t"]], axis=1),  # (H,8H)
        "whh1_t": l1["whh_t"],
        "b1": l1["bias"],
    }
    if target_size == 1:
        packed["vw"] = raw["V_w"]                              # (1, H)
        packed["vb"] = raw["V_b"].reshape(1, 1)
    else:
        packed["vw"] = raw["V_w"].T                            # (H, target)
        packed["vb"] = raw["V_b"].reshape(1, target_size)
    return packed


# ----------------------------------------------------------------------------
# Pure-JAX reference (PyTorch-layout params, standard i,f,g,o gate order)
# ----------------------------------------------------------------------------
def rnn_module_ref(params, x, hidden_dim, target_size):
    B, T, _ = x.shape
    inp = x
    h_list, c_list = [], []
    for lp in params["lstm"]:
        wih_t, whh_t = lp["w_ih"].T, lp["w_hh"].T
        bias = lp["b_ih"] + lp["b_hh"]

        def step(carry, x_t, wih_t=wih_t, whh_t=whh_t, bias=bias):
            h, c = carry
            gates = x_t @ wih_t + h @ whh_t + bias
            i = jax.nn.sigmoid(gates[:, :hidden_dim])
            f = jax.nn.sigmoid(gates[:, hidden_dim:2 * hidden_dim])
            g = jnp.tanh(gates[:, 2 * hidden_dim:3 * hidden_dim])
            o = jax.nn.sigmoid(gates[:, 3 * hidden_dim:])
            c_new = f * c + i * g
            h_new = o * jnp.tanh(c_new)
            return (h_new, c_new), h_new

        h0 = jnp.zeros((B, hidden_dim), jnp.float32)
        c0 = jnp.zeros((B, hidden_dim), jnp.float32)
        (h_n, c_n), outs = jax.lax.scan(step, (h0, c0),
                                        jnp.transpose(inp, (1, 0, 2)))
        inp = jnp.transpose(outs, (1, 0, 2))
        h_list.append(h_n)
        c_list.append(c_n)
    preds = (inp @ params["V_w"].T + params["V_b"]).reshape(B, T, target_size)
    return preds, (jnp.stack(h_list), jnp.stack(c_list))


# ----------------------------------------------------------------------------
# Deterministic parameter init (PyTorch-style U(-1/sqrt(H), 1/sqrt(H)),
# PyTorch weight layout: W_ih (4H, in), W_hh (4H, H), gate order i,f,g,o)
# ----------------------------------------------------------------------------
def init_params(key, input_size, hidden_dim, num_layers, target_size):
    bound = 1.0 / np.sqrt(hidden_dim)
    params = {"lstm": []}
    for layer in range(num_layers):
        in_sz = input_size if layer == 0 else hidden_dim
        key, k1, k2, k3, k4 = jax.random.split(key, 5)
        params["lstm"].append({
            "w_ih": jax.random.uniform(k1, (4 * hidden_dim, in_sz), jnp.float32,
                                       -bound, bound),
            "w_hh": jax.random.uniform(k2, (4 * hidden_dim, hidden_dim),
                                       jnp.float32, -bound, bound),
            "b_ih": jax.random.uniform(k3, (4 * hidden_dim,), jnp.float32,
                                       -bound, bound),
            "b_hh": jax.random.uniform(k4, (4 * hidden_dim,), jnp.float32,
                                       -bound, bound),
        })
    key, k5, k6 = jax.random.split(key, 3)
    params["V_w"] = jax.random.uniform(k5, (target_size, hidden_dim),
                                       jnp.float32, -bound, bound)
    params["V_b"] = jax.random.uniform(k6, (target_size,), jnp.float32,
                                       -bound, bound)
    return params


# ----------------------------------------------------------------------------
# Main
# ----------------------------------------------------------------------------
if __name__ == "__main__":
    batch, seq_len = 2, 8
    input_size, hidden_dim, num_layers, target_size = 4, 32, 2, 1

    key = jax.random.PRNGKey(0)
    key, xk = jax.random.split(key)
    x = jax.random.normal(xk, (batch, seq_len, input_size), jnp.float32)

    raw_params = init_params(key, input_size, hidden_dim, num_layers, target_size)
    packed_params = pack_params(raw_params, hidden_dim, target_size)

    fwd = jax.jit(functools.partial(rnn_module_forward, hidden_dim=hidden_dim,
                                    target_size=target_size))
    preds, (h_n, c_n) = fwd(packed_params, x)
    preds = jax.block_until_ready(preds)
    h_n = jax.block_until_ready(h_n)
    c_n = jax.block_until_ready(c_n)

    assert preds.shape == (batch, seq_len, target_size)
    assert h_n.shape == (num_layers, batch, hidden_dim)
    assert c_n.shape == (num_layers, batch, hidden_dim)

    # Correctness vs. pure-JAX reference
    preds_r, (h_r, c_r) = rnn_module_ref(raw_params, x, hidden_dim, target_size)
    np.testing.assert_allclose(np.asarray(preds), np.asarray(preds_r),
                               rtol=1e-5, atol=1e-5)
    np.testing.assert_allclose(np.asarray(h_n), np.asarray(h_r),
                               rtol=1e-5, atol=1e-5)
    np.testing.assert_allclose(np.asarray(c_n), np.asarray(c_r),
                               rtol=1e-5, atol=1e-5)

    print("KERNEL_OK")
</pallas_src>

<mosaic_0001>
module attributes {stable_mosaic.version = 11 : i64} {
  func.func @_fused_lstm_kernel(%arg0: memref<2x8x4xf32, #tpu.memory_space<vmem>>, %arg1: memref<4x128xf32, #tpu.memory_space<vmem>>, %arg2: memref<1x128xf32, #tpu.memory_space<vmem>>, %arg3: memref<32x256xf32, #tpu.memory_space<vmem>>, %arg4: memref<32x128xf32, #tpu.memory_space<vmem>>, %arg5: memref<1x128xf32, #tpu.memory_space<vmem>>, %arg6: memref<1x32xf32, #tpu.memory_space<vmem>>, %arg7: memref<1x1xf32, #tpu.memory_space<vmem>>, %arg8: memref<2x8xf32, #tpu.memory_space<vmem>>, %arg9: memref<2x2x32xf32, #tpu.memory_space<vmem>>, %arg10: memref<2x2x32xf32, #tpu.memory_space<vmem>>, %arg11: memref<2x8x128xf32, #tpu.memory_space<vmem>>) attributes {dimension_semantics = [], scalar_prefetch = 0 : i64, scratch_operands = 1 : i64, tpu.core_type = #tpu.core_type<tc>} {
    %c0 = arith.constant 0 : index
    %c0_0 = arith.constant 0 : index
    %c0_1 = arith.constant 0 : index
    %0 = vector.load %arg0[%c0, %c0_0, %c0_1] : memref<2x8x4xf32, #tpu.memory_space<vmem>>, vector<2x8x4xf32>
    %1 = vector.shape_cast %0 : vector<2x8x4xf32> to vector<16x4xf32>
    %c0_2 = arith.constant 0 : index
    %c0_3 = arith.constant 0 : index
    %2 = vector.load %arg1[%c0_2, %c0_3] : memref<4x128xf32, #tpu.memory_space<vmem>>, vector<4x128xf32>
    %cst = arith.constant dense<0.000000e+00> : vector<16x128xf32>
    %3 = tpu.matmul %1, %2, %cst {dimension_numbers = #tpu.dot_dimension_numbers<[1], [0], [0], [1], [0, 0, 1, 1], [], []>} : vector<16x4xf32>, vector<4x128xf32>, vector<16x128xf32> -> vector<16x128xf32>
    %c0_4 = arith.constant 0 : index
    %c0_5 = arith.constant 0 : index
    %4 = vector.load %arg2[%c0_4, %c0_5] : memref<1x128xf32, #tpu.memory_space<vmem>>, vector<1x128xf32>
    %5 = vector.broadcast %4 : vector<1x128xf32> to vector<16x128xf32>
    %6 = arith.addf %3, %5 : vector<16x128xf32>
    %7 = vector.shape_cast %6 : vector<16x128xf32> to vector<2x8x128xf32>
    %c0_6 = arith.constant 0 : index
    %c0_7 = arith.constant 0 : index
    %c0_8 = arith.constant 0 : index
    %8 = vector.load %arg11[%c0_6, %c0_7, %c0_8] : memref<2x8x128xf32, #tpu.memory_space<vmem>>, vector<2x8x128xf32>
    tpu.vector_store %arg11[%c0_6, %c0_7, %c0_8], %7 {strides = array<i32>} : memref<2x8x128xf32, #tpu.memory_space<vmem>>, vector<2x8x128xf32>,
    %c0_9 = arith.constant 0 : index
    %c0_10 = arith.constant 0 : index
    %9 = vector.load %arg3[%c0_9, %c0_10] : memref<32x256xf32, #tpu.memory_space<vmem>>, vector<32x256xf32>
    %c0_11 = arith.constant 0 : index
    %c0_12 = arith.constant 0 : index
    %10 = vector.load %arg4[%c0_11, %c0_12] : memref<32x128xf32, #tpu.memory_space<vmem>>, vector<32x128xf32>
    %c0_13 = arith.constant 0 : index
    %c0_14 = arith.constant 0 : index
    %11 = vector.load %arg5[%c0_13, %c0_14] : memref<1x128xf32, #tpu.memory_space<vmem>>, vector<1x128xf32>
    %12 = vector.shape_cast %11 : vector<1x128xf32> to vector<1x128xf32>
    %13 = vector.broadcast %12 : vector<1x128xf32> to vector<2x128xf32>
    %cst_15 = arith.constant 0.000000e+00 : f32
    %14 = vector.broadcast %cst_15 : f32 to vector<2x32xf32>
    %cst_16 = arith.constant 0.000000e+00 : f32
    %15 = vector.broadcast %cst_16 : f32 to vector<2x128xf32>
    %c0_17 = arith.constant 0 : index
    %c0_18 = arith.constant 0 : index
    %c0_19 = arith.constant 0 : index
    %16 = vector.load %arg11[%c0_17, %c0_18, %c0_19] : memref<2x8x128xf32, #tpu.memory_space<vmem>>, vector<2x1x128xf32>
    %17 = vector.shape_cast %16 : vector<2x1x128xf32> to vector<2x128xf32>
    %18 = arith.addf %17, %15 : vector<2x128xf32>
    %19 = vector.extract_strided_slice %18 {offsets = [0, 0], sizes = [2, 96], strides = [1, 1]} : vector<2x128xf32> to vector<2x96xf32>
    %20 = arith.negf %19 : vector<2x96xf32>
    %21 = math.exp %20 : vector<2x96xf32>
    %cst_20 = arith.constant 1.000000e+00 : f32
    %22 = vector.broadcast %cst_20 : f32 to vector<2x96xf32>
    %23 = arith.addf %22, %21 : vector<2x96xf32>
    %24 = arith.divf %22, %23 : vector<2x96xf32>
    %25 = vector.extract_strided_slice %18 {offsets = [0, 96], sizes = [2, 32], strides = [1, 1]} : vector<2x128xf32> to vector<2x32xf32>
    %26 = math.tanh %25 : vector<2x32xf32>
    %27 = vector.extract_strided_slice %24 {offsets = [0, 32], sizes = [2, 32], strides = [1, 1]} : vector<2x96xf32> to vector<2x32xf32>
    %28 = arith.mulf %27, %14 : vector<2x32xf32>
    %29 = vector.extract_strided_slice %24 {offsets = [0, 0], sizes = [2, 32], strides = [1, 1]} : vector<2x96xf32> to vector<2x32xf32>
    %30 = arith.mulf %29, %26 : vector<2x32xf32>
    %31 = arith.addf %28, %30 : vector<2x32xf32>
    %32 = vector.extract_strided_slice %24 {offsets = [0, 64], sizes = [2, 32], strides = [1, 1]} : vector<2x96xf32> to vector<2x32xf32>
    %33 = math.tanh %31 : vector<2x32xf32>
    %34 = arith.mulf %32, %33 : vector<2x32xf32>
    %cst_21 = arith.constant dense<0.000000e+00> : vector<2x128xf32>
    %35 = tpu.matmul %14, %10, %cst_21 {dimension_numbers = #tpu.dot_dimension_numbers<[1], [0], [0], [1], [0, 0, 1, 1], [], []>} : vector<2x32xf32>, vector<32x128xf32>, vector<2x128xf32> -> vector<2x128xf32>
    %cst_22 = arith.constant dense<0.000000e+00> : vector<2x256xf32>
    %36 = tpu.matmul %34, %9, %cst_22 {dimension_numbers = #tpu.dot_dimension_numbers<[1], [0], [0], [1], [0, 0, 1, 1], [], []>} : vector<2x32xf32>, vector<32x256xf32>, vector<2x256xf32> -> vector<2x256xf32>
    %37 = vector.extract_strided_slice %36 {offsets = [0, 0], sizes = [2, 128], strides = [1, 1]} : vector<2x256xf32> to vector<2x128xf32>
    %38 = arith.addf %37, %35 : vector<2x128xf32>
    %39 = arith.addf %38, %13 : vector<2x128xf32>
    %40 = vector.extract_strided_slice %39 {offsets = [0, 0], sizes = [2, 96], strides = [1, 1]} : vector<2x128xf32> to vector<2x96xf32>
    %41 = arith.negf %40 : vector<2x96xf32>
    %42 = math.exp %41 : vector<2x96xf32>
    %cst_23 = arith.constant 1.000000e+00 : f32
    %43 = vector.broadcast %cst_23 : f32 to vector<2x96xf32>
    %44 = arith.addf %43, %42 : vector<2x96xf32>
    %45 = arith.divf %43, %44 : vector<2x96xf32>
    %46 = vector.extract_strided_slice %39 {offsets = [0, 96], sizes = [2, 32], strides = [1, 1]} : vector<2x128xf32> to vector<2x32xf32>
    %47 = math.tanh %46 : vector<2x32xf32>
    %48 = vector.extract_strided_slice %45 {offsets = [0, 32], sizes = [2, 32], strides = [1, 1]} : vector<2x96xf32> to vector<2x32xf32>
    %49 = arith.mulf %48, %14 : vector<2x32xf32>
    %50 = vector.extract_strided_slice %45 {offsets = [0, 0], sizes = [2, 32], strides = [1, 1]} : vector<2x96xf32> to vector<2x32xf32>
    %51 = arith.mulf %50, %47 : vector<2x32xf32>
    %52 = arith.addf %49, %51 : vector<2x32xf32>
    %53 = vector.extract_strided_slice %45 {offsets = [0, 64], sizes = [2, 32], strides = [1, 1]} : vector<2x96xf32> to vector<2x32xf32>
    %54 = math.tanh %52 : vector<2x32xf32>
    %55 = arith.mulf %53, %54 : vector<2x32xf32>
    %56 = vector.extract_strided_slice %36 {offsets = [0, 128], sizes = [2, 128], strides = [1, 1]} : vector<2x256xf32> to vector<2x128xf32>
    %c0_24 = arith.constant 0 : index
    %c1 = arith.constant 1 : index
    %c0_25 = arith.constant 0 : index
    %57 = vector.load %arg11[%c0_24, %c1, %c0_25] : memref<2x8x128xf32, #tpu.memory_space<vmem>>, vector<2x1x128xf32>
    %58 = vector.shape_cast %57 : vector<2x1x128xf32> to vector<2x128xf32>
    %59 = arith.addf %58, %56 : vector<2x128xf32>
    %60 = vector.extract_strided_slice %59 {offsets = [0, 0], sizes = [2, 96], strides = [1, 1]} : vector<2x128xf32> to vector<2x96xf32>
    %61 = arith.negf %60 : vector<2x96xf32>
    %62 = math.exp %61 : vector<2x96xf32>
    %cst_26 = arith.constant 1.000000e+00 : f32
    %63 = vector.broadcast %cst_26 : f32 to vector<2x96xf32>
    %64 = arith.addf %63, %62 : vector<2x96xf32>
    %65 = arith.divf %63, %64 : vector<2x96xf32>
    %66 = vector.extract_strided_slice %59 {offsets = [0, 96], sizes = [2, 32], strides = [1, 1]} : vector<2x128xf32> to vector<2x32xf32>
    %67 = math.tanh %66 : vector<2x32xf32>
    %68 = vector.extract_strided_slice %65 {offsets = [0, 32], sizes = [2, 32], strides = [1, 1]} : vector<2x96xf32> to vector<2x32xf32>
    %69 = arith.mulf %68, %31 : vector<2x32xf32>
    %70 = vector.extract_strided_slice %65 {offsets = [0, 0], sizes = [2, 32], strides = [1, 1]} : vector<2x96xf32> to vector<2x32xf32>
    %71 = arith.mulf %70, %67 : vector<2x32xf32>
    %72 = arith.addf %69, %71 : vector<2x32xf32>
    %73 = vector.extract_strided_slice %65 {offsets = [0, 64], sizes = [2, 32], strides = [1, 1]} : vector<2x96xf32> to vector<2x32xf32>
    %74 = math.tanh %72 : vector<2x32xf32>
    %75 = arith.mulf %73, %74 : vector<2x32xf32>
    %cst_27 = arith.constant dense<0.000000e+00> : vector<2x128xf32>
    %76 = tpu.matmul %55, %10, %cst_27 {dimension_numbers = #tpu.dot_dimension_numbers<[1], [0], [0], [1], [0, 0, 1, 1], [], []>} : vector<2x32xf32>, vector<32x128xf32>, vector<2x128xf32> -> vector<2x128xf32>
    %cst_28 = arith.constant dense<0.000000e+00> : vector<2x256xf32>
    %77 = tpu.matmul %75, %9, %cst_28 {dimension_numbers = #tpu.dot_dimension_numbers<[1], [0], [0], [1], [0, 0, 1, 1], [], []>} : vector<2x32xf32>, vector<32x256xf32>, vector<2x256xf32> -> vector<2x256xf32>
    %78 = vector.extract_strided_slice %77 {offsets = [0, 0], sizes = [2, 128], strides = [1, 1]} : vector<2x256xf32> to vector<2x128xf32>
    %79 = arith.addf %78, %76 : vector<2x128xf32>
    %80 = arith.addf %79, %13 : vector<2x128xf32>
    %81 = vector.extract_strided_slice %80 {offsets = [0, 0], sizes = [2, 96], strides = [1, 1]} : vector<2x128xf32> to vector<2x96xf32>
    %82 = arith.negf %81 : vector<2x96xf32>
    %83 = math.exp %82 : vector<2x96xf32>
    %cst_29 = arith.constant 1.000000e+00 : f32
    %84 = vector.broadcast %cst_29 : f32 to vector<2x96xf32>
    %85 = arith.addf %84, %83 : vector<2x96xf32>
    %86 = arith.divf %84, %85 : vector<2x96xf32>
    %87 = vector.extract_strided_slice %80 {offsets = [0, 96], sizes = [2, 32], strides = [1, 1]} : vector<2x128xf32> to vector<2x32xf32>
    %88 = math.tanh %87 : vector<2x32xf32>
    %89 = vector.extract_strided_slice %86 {offsets = [0, 32], sizes = [2, 32], strides = [1, 1]} : vector<2x96xf32> to vector<2x32xf32>
    %90 = arith.mulf %89, %52 : vector<2x32xf32>
    %91 = vector.extract_strided_slice %86 {offsets = [0, 0], sizes = [2, 32], strides = [1, 1]} : vector<2x96xf32> to vector<2x32xf32>
    %92 = arith.mulf %91, %88 : vector<2x32xf32>
    %93 = arith.addf %90, %92 : vector<2x32xf32>
    %94 = vector.extract_strided_slice %86 {offsets = [0, 64], sizes = [2, 32], strides = [1, 1]} : vector<2x96xf32> to vector<2x32xf32>
    %95 = math.tanh %93 : vector<2x32xf32>
    %96 = arith.mulf %94, %95 : vector<2x32xf32>
    %97 = vector.extract_strided_slice %77 {offsets = [0, 128], sizes = [2, 128], strides = [1, 1]} : vector<2x256xf32> to vector<2x128xf32>
    %c0_30 = arith.constant 0 : index
    %c2 = arith.constant 2 : index
    %c0_31 = arith.constant 0 : index
    %98 = vector.load %arg11[%c0_30, %c2, %c0_31] : memref<2x8x128xf32, #tpu.memory_space<vmem>>, vector<2x1x128xf32>
    %99 = vector.shape_cast %98 : vector<2x1x128xf32> to vector<2x128xf32>
    %100 = arith.addf %99, %97 : vector<2x128xf32>
    %101 = vector.extract_strided_slice %100 {offsets = [0, 0], sizes = [2, 96], strides = [1, 1]} : vector<2x128xf32> to vector<2x96xf32>
    %102 = arith.negf %101 : vector<2x96xf32>
    %103 = math.exp %102 : vector<2x96xf32>
    %cst_32 = arith.constant 1.000000e+00 : f32
    %104 = vector.broadcast %cst_32 : f32 to vector<2x96xf32>
    %105 = arith.addf %104, %103 : vector<2x96xf32>
    %106 = arith.divf %104, %105 : vector<2x96xf32>
    %107 = vector.extract_strided_slice %100 {offsets = [0, 96], sizes = [2, 32], strides = [1, 1]} : vector<2x128xf32> to vector<2x32xf32>
    %108 = math.tanh %107 : vector<2x32xf32>
    %109 = vector.extract_strided_slice %106 {offsets = [0, 32], sizes = [2, 32], strides = [1, 1]} : vector<2x96xf32> to vector<2x32xf32>
    %110 = arith.mulf %109, %72 : vector<2x32xf32>
    %111 = vector.extract_strided_slice %106 {offsets = [0, 0], sizes = [2, 32], strides = [1, 1]} : vector<2x96xf32> to vector<2x32xf32>
    %112 = arith.mulf %111, %108 : vector<2x32xf32>
    %113 = arith.addf %110, %112 : vector<2x32xf32>
    %114 = vector.extract_strided_slice %106 {offsets = [0, 64], sizes = [2, 32], strides = [1, 1]} : vector<2x96xf32> to vector<2x32xf32>
    %115 = math.tanh %113 : vector<2x32xf32>
    %116 = arith.mulf %114, %115 : vector<2x32xf32>
    %cst_33 = arith.constant dense<0.000000e+00> : vector<2x128xf32>
    %117 = tpu.matmul %96, %10, %cst_33 {dimension_numbers = #tpu.dot_dimension_numbers<[1], [0], [0], [1], [0, 0, 1, 1], [], []>} : vector<2x32xf32>, vector<32x128xf32>, vector<2x128xf32> -> vector<2x128xf32>
    %cst_34 = arith.constant dense<0.000000e+00> : vector<2x256xf32>
    %118 = tpu.matmul %116, %9, %cst_34 {dimension_numbers = #tpu.dot_dimension_numbers<[1], [0], [0], [1], [0, 0, 1, 1], [], []>} : vector<2x32xf32>, vector<32x256xf32>, vector<2x256xf32> -> vector<2x256xf32>
    %119 = vector.extract_strided_slice %118 {offsets = [0, 0], sizes = [2, 128], strides = [1, 1]} : vector<2x256xf32> to vector<2x128xf32>
    %120 = arith.addf %119, %117 : vector<2x128xf32>
    %121 = arith.addf %120, %13 : vector<2x128xf32>
    %122 = vector.extract_strided_slice %121 {offsets = [0, 0], sizes = [2, 96], strides = [1, 1]} : vector<2x128xf32> to vector<2x96xf32>
    %123 = arith.negf %122 : vector<2x96xf32>
    %124 = math.exp %123 : vector<2x96xf32>
    %cst_35 = arith.constant 1.000000e+00 : f32
    %125 = vector.broadcast %cst_35 : f32 to vector<2x96xf32>
    %126 = arith.addf %125, %124 : vector<2x96xf32>
    %127 = arith.divf %125, %126 : vector<2x96xf32>
    %128 = vector.extract_strided_slice %121 {offsets = [0, 96], sizes = [2, 32], strides = [1, 1]} : vector<2x128xf32> to vector<2x32xf32>
    %129 = math.tanh %128 : vector<2x32xf32>
    %130 = vector.extract_strided_slice %127 {offsets = [0, 32], sizes = [2, 32], strides = [1, 1]} : vector<2x96xf32> to vector<2x32xf32>
    %131 = arith.mulf %130, %93 : vector<2x32xf32>
    %132 = vector.extract_strided_slice %127 {offsets = [0, 0], sizes = [2, 32], strides = [1, 1]} : vector<2x96xf32> to vector<2x32xf32>
    %133 = arith.mulf %132, %129 : vector<2x32xf32>
    %134 = arith.addf %131, %133 : vector<2x32xf32>
    %135 = vector.extract_strided_slice %127 {offsets = [0, 64], sizes = [2, 32], strides = [1, 1]} : vector<2x96xf32> to vector<2x32xf32>
    %136 = math.tanh %134 : vector<2x32xf32>
    %137 = arith.mulf %135, %136 : vector<2x32xf32>
    %138 = vector.extract_strided_slice %118 {offsets = [0, 128], sizes = [2, 128], strides = [1, 1]} : vector<2x256xf32> to vector<2x128xf32>
    %c0_36 = arith.constant 0 : index
    %c3 = arith.constant 3 : index
    %c0_37 = arith.constant 0 : index
    %139 = vector.load %arg11[%c0_36, %c3, %c0_37] : memref<2x8x128xf32, #tpu.memory_space<vmem>>, vector<2x1x128xf32>
    %140 = vector.shape_cast %139 : vector<2x1x128xf32> to vector<2x128xf32>
    %141 = arith.addf %140, %138 : vector<2x128xf32>
    %142 = vector.extract_strided_slice %141 {offsets = [0, 0], sizes = [2, 96], strides = [1, 1]} : vector<2x128xf32> to vector<2x96xf32>
    %143 = arith.negf %142 : vector<2x96xf32>
    %144 = math.exp %143 : vector<2x96xf32>
    %cst_38 = arith.constant 1.000000e+00 : f32
    %145 = vector.broadcast %cst_38 : f32 to vector<2x96xf32>
    %146 = arith.addf %145, %144 : vector<2x96xf32>
    %147 = arith.divf %145, %146 : vector<2x96xf32>
    %148 = vector.extract_strided_slice %141 {offsets = [0, 96], sizes = [2, 32], strides = [1, 1]} : vector<2x128xf32> to vector<2x32xf32>
    %149 = math.tanh %148 : vector<2x32xf32>
    %150 = vector.extract_strided_slice %147 {offsets = [0, 32], sizes = [2, 32], strides = [1, 1]} : vector<2x96xf32> to vector<2x32xf32>
    %151 = arith.mulf %150, %113 : vector<2x32xf32>
    %152 = vector.extract_strided_slice %147 {offsets = [0, 0], sizes = [2, 32], strides = [1, 1]} : vector<2x96xf32> to vector<2x32xf32>
    %153 = arith.mulf %152, %149 : vector<2x32xf32>
    %154 = arith.addf %151, %153 : vector<2x32xf32>
    %155 = vector.extract_strided_slice %147 {offsets = [0, 64], sizes = [2, 32], strides = [1, 1]} : vector<2x96xf32> to vector<2x32xf32>
    %156 = math.tanh %154 : vector<2x32xf32>
    %157 = arith.mulf %155, %156 : vector<2x32xf32>
    %cst_39 = arith.constant dense<0.000000e+00> : vector<2x128xf32>
    %158 = tpu.matmul %137, %10, %cst_39 {dimension_numbers = #tpu.dot_dimension_numbers<[1], [0], [0], [1], [0, 0, 1, 1], [], []>} : vector<2x32xf32>, vector<32x128xf32>, vector<2x128xf32> -> vector<2x128xf32>
    %cst_40 = arith.constant dense<0.000000e+00> : vector<2x256xf32>
    %159 = tpu.matmul %157, %9, %cst_40 {dimension_numbers = #tpu.dot_dimension_numbers<[1], [0], [0], [1], [0, 0, 1, 1], [], []>} : vector<2x32xf32>, vector<32x256xf32>, vector<2x256xf32> -> vector<2x256xf32>
    %160 = vector.extract_strided_slice %159 {offsets = [0, 0], sizes = [2, 128], strides = [1, 1]} : vector<2x256xf32> to vector<2x128xf32>
    %161 = arith.addf %160, %158 : vector<2x128xf32>
    %162 = arith.addf %161, %13 : vector<2x128xf32>
    %163 = vector.extract_strided_slice %162 {offsets = [0, 0], sizes = [2, 96], strides = [1, 1]} : vector<2x128xf32> to vector<2x96xf32>
    %164 = arith.negf %163 : vector<2x96xf32>
    %165 = math.exp %164 : vector<2x96xf32>
    %cst_41 = arith.constant 1.000000e+00 : f32
    %166 = vector.broadcast %cst_41 : f32 to vector<2x96xf32>
    %167 = arith.addf %166, %165 : vector<2x96xf32>
    %168 = arith.divf %166, %167 : vector<2x96xf32>
    %169 = vector.extract_strided_slice %162 {offsets = [0, 96], sizes = [2, 32], strides = [1, 1]} : vector<2x128xf32> to vector<2x32xf32>
    %170 = math.tanh %169 : vector<2x32xf32>
    %171 = vector.extract_strided_slice %168 {offsets = [0, 32], sizes = [2, 32], strides = [1, 1]} : vector<2x96xf32> to vector<2x32xf32>
    %172 = arith.mulf %171, %134 : vector<2x32xf32>
    %173 = vector.extract_strided_slice %168 {offsets = [0, 0], sizes = [2, 32], strides = [1, 1]} : vector<2x96xf32> to vector<2x32xf32>
    %174 = arith.mulf %173, %170 : vector<2x32xf32>
    %175 = arith.addf %172, %174 : vector<2x32xf32>
    %176 = vector.extract_strided_slice %168 {offsets = [0, 64], sizes = [2, 32], strides = [1, 1]} : vector<2x96xf32> to vector<2x32xf32>
    %177 = math.tanh %175 : vector<2x32xf32>
    %178 = arith.mulf %176, %177 : vector<2x32xf32>
    %179 = vector.extract_strided_slice %159 {offsets = [0, 128], sizes = [2, 128], strides = [1, 1]} : vector<2x256xf32> to vector<2x128xf32>
    %c0_42 = arith.constant 0 : index
    %c4 = arith.constant 4 : index
    %c0_43 = arith.constant 0 : index
    %180 = vector.load %arg11[%c0_42, %c4, %c0_43] : memref<2x8x128xf32, #tpu.memory_space<vmem>>, vector<2x1x128xf32>
    %181 = vector.shape_cast %180 : vector<2x1x128xf32> to vector<2x128xf32>
    %182 = arith.addf %181, %179 : vector<2x128xf32>
    %183 = vector.extract_strided_slice %182 {offsets = [0, 0], sizes = [2, 96], strides = [1, 1]} : vector<2x128xf32> to vector<2x96xf32>
    %184 = arith.negf %183 : vector<2x96xf32>
    %185 = math.exp %184 : vector<2x96xf32>
    %cst_44 = arith.constant 1.000000e+00 : f32
    %186 = vector.broadcast %cst_44 : f32 to vector<2x96xf32>
    %187 = arith.addf %186, %185 : vector<2x96xf32>
    %188 = arith.divf %186, %187 : vector<2x96xf32>
    %189 = vector.extract_strided_slice %182 {offsets = [0, 96], sizes = [2, 32], strides = [1, 1]} : vector<2x128xf32> to vector<2x32xf32>
    %190 = math.tanh %189 : vector<2x32xf32>
    %191 = vector.extract_strided_slice %188 {offsets = [0, 32], sizes = [2, 32], strides = [1, 1]} : vector<2x96xf32> to vector<2x32xf32>
    %192 = arith.mulf %191, %154 : vector<2x32xf32>
    %193 = vector.extract_strided_slice %188 {offsets = [0, 0], sizes = [2, 32], strides = [1, 1]} : vector<2x96xf32> to vector<2x32xf32>
    %194 = arith.mulf %193, %190 : vector<2x32xf32>
    %195 = arith.addf %192, %194 : vector<2x32xf32>
    %196 = vector.extract_strided_slice %188 {offsets = [0, 64], sizes = [2, 32], strides = [1, 1]} : vector<2x96xf32> to vector<2x32xf32>
    %197 = math.tanh %195 : vector<2x32xf32>
    %198 = arith.mulf %196, %197 : vector<2x32xf32>
    %cst_45 = arith.constant dense<0.000000e+00> : vector<2x128xf32>
    %199 = tpu.matmul %178, %10, %cst_45 {dimension_numbers = #tpu.dot_dimension_numbers<[1], [0], [0], [1], [0, 0, 1, 1], [], []>} : vector<2x32xf32>, vector<32x128xf32>, vector<2x128xf32> -> vector<2x128xf32>
    %cst_46 = arith.constant dense<0.000000e+00> : vector<2x256xf32>
    %200 = tpu.matmul %198, %9, %cst_46 {dimension_numbers = #tpu.dot_dimension_numbers<[1], [0], [0], [1], [0, 0, 1, 1], [], []>} : vector<2x32xf32>, vector<32x256xf32>, vector<2x256xf32> -> vector<2x256xf32>
    %201 = vector.extract_strided_slice %200 {offsets = [0, 0], sizes = [2, 128], strides = [1, 1]} : vector<2x256xf32> to vector<2x128xf32>
    %202 = arith.addf %201, %199 : vector<2x128xf32>
    %203 = arith.addf %202, %13 : vector<2x128xf32>
    %204 = vector.extract_strided_slice %203 {offsets = [0, 0], sizes = [2, 96], strides = [1, 1]} : vector<2x128xf32> to vector<2x96xf32>
    %205 = arith.negf %204 : vector<2x96xf32>
    %206 = math.exp %205 : vector<2x96xf32>
    %cst_47 = arith.constant 1.000000e+00 : f32
    %207 = vector.broadcast %cst_47 : f32 to vector<2x96xf32>
    %208 = arith.addf %207, %206 : vector<2x96xf32>
    %209 = arith.divf %207, %208 : vector<2x96xf32>
    %210 = vector.extract_strided_slice %203 {offsets = [0, 96], sizes = [2, 32], strides = [1, 1]} : vector<2x128xf32> to vector<2x32xf32>
    %211 = math.tanh %210 : vector<2x32xf32>
    %212 = vector.extract_strided_slice %209 {offsets = [0, 32], sizes = [2, 32], strides = [1, 1]} : vector<2x96xf32> to vector<2x32xf32>
    %213 = arith.mulf %212, %175 : vector<2x32xf32>
    %214 = vector.extract_strided_slice %209 {offsets = [0, 0], sizes = [2, 32], strides = [1, 1]} : vector<2x96xf32> to vector<2x32xf32>
    %215 = arith.mulf %214, %211 : vector<2x32xf32>
    %216 = arith.addf %213, %215 : vector<2x32xf32>
    %217 = vector.extract_strided_slice %209 {offsets = [0, 64], sizes = [2, 32], strides = [1, 1]} : vector<2x96xf32> to vector<2x32xf32>
    %218 = math.tanh %216 : vector<2x32xf32>
    %219 = arith.mulf %217, %218 : vector<2x32xf32>
    %220 = vector.extract_strided_slice %200 {offsets = [0, 128], sizes = [2, 128], strides = [1, 1]} : vector<2x256xf32> to vector<2x128xf32>
    %c0_48 = arith.constant 0 : index
    %c5 = arith.constant 5 : index
    %c0_49 = arith.constant 0 : index
    %221 = vector.load %arg11[%c0_48, %c5, %c0_49] : memref<2x8x128xf32, #tpu.memory_space<vmem>>, vector<2x1x128xf32>
    %222 = vector.shape_cast %221 : vector<2x1x128xf32> to vector<2x128xf32>
    %223 = arith.addf %222, %220 : vector<2x128xf32>
    %224 = vector.extract_strided_slice %223 {offsets = [0, 0], sizes = [2, 96], strides = [1, 1]} : vector<2x128xf32> to vector<2x96xf32>
    %225 = arith.negf %224 : vector<2x96xf32>
    %226 = math.exp %225 : vector<2x96xf32>
    %cst_50 = arith.constant 1.000000e+00 : f32
    %227 = vector.broadcast %cst_50 : f32 to vector<2x96xf32>
    %228 = arith.addf %227, %226 : vector<2x96xf32>
    %229 = arith.divf %227, %228 : vector<2x96xf32>
    %230 = vector.extract_strided_slice %223 {offsets = [0, 96], sizes = [2, 32], strides = [1, 1]} : vector<2x128xf32> to vector<2x32xf32>
    %231 = math.tanh %230 : vector<2x32xf32>
    %232 = vector.extract_strided_slice %229 {offsets = [0, 32], sizes = [2, 32], strides = [1, 1]} : vector<2x96xf32> to vector<2x32xf32>
    %233 = arith.mulf %232, %195 : vector<2x32xf32>
    %234 = vector.extract_strided_slice %229 {offsets = [0, 0], sizes = [2, 32], strides = [1, 1]} : vector<2x96xf32> to vector<2x32xf32>
    %235 = arith.mulf %234, %231 : vector<2x32xf32>
    %236 = arith.addf %233, %235 : vector<2x32xf32>
    %237 = vector.extract_strided_slice %229 {offsets = [0, 64], sizes = [2, 32], strides = [1, 1]} : vector<2x96xf32> to vector<2x32xf32>
    %238 = math.tanh %236 : vector<2x32xf32>
    %239 = arith.mulf %237, %238 : vector<2x32xf32>
    %cst_51 = arith.constant dense<0.000000e+00> : vector<2x128xf32>
    %240 = tpu.matmul %219, %10, %cst_51 {dimension_numbers = #tpu.dot_dimension_numbers<[1], [0], [0], [1], [0, 0, 1, 1], [], []>} : vector<2x32xf32>, vector<32x128xf32>, vector<2x128xf32> -> vector<2x128xf32>
    %cst_52 = arith.constant dense<0.000000e+00> : vector<2x256xf32>
    %241 = tpu.matmul %239, %9, %cst_52 {dimension_numbers = #tpu.dot_dimension_numbers<[1], [0], [0], [1], [0, 0, 1, 1], [], []>} : vector<2x32xf32>, vector<32x256xf32>, vector<2x256xf32> -> vector<2x256xf32>
    %242 = vector.extract_strided_slice %241 {offsets = [0, 0], sizes = [2, 128], strides = [1, 1]} : vector<2x256xf32> to vector<2x128xf32>
    %243 = arith.addf %242, %240 : vector<2x128xf32>
    %244 = arith.addf %243, %13 : vector<2x128xf32>
    %245 = vector.extract_strided_slice %244 {offsets = [0, 0], sizes = [2, 96], strides = [1, 1]} : vector<2x128xf32> to vector<2x96xf32>
    %246 = arith.negf %245 : vector<2x96xf32>
    %247 = math.exp %246 : vector<2x96xf32>
    %cst_53 = arith.constant 1.000000e+00 : f32
    %248 = vector.broadcast %cst_53 : f32 to vector<2x96xf32>
    %249 = arith.addf %248, %247 : vector<2x96xf32>
    %250 = arith.divf %248, %249 : vector<2x96xf32>
    %251 = vector.extract_strided_slice %244 {offsets = [0, 96], sizes = [2, 32], strides = [1, 1]} : vector<2x128xf32> to vector<2x32xf32>
    %252 = math.tanh %251 : vector<2x32xf32>
    %253 = vector.extract_strided_slice %250 {offsets = [0, 32], sizes = [2, 32], strides = [1, 1]} : vector<2x96xf32> to vector<2x32xf32>
    %254 = arith.mulf %253, %216 : vector<2x32xf32>
    %255 = vector.extract_strided_slice %250 {offsets = [0, 0], sizes = [2, 32], strides = [1, 1]} : vector<2x96xf32> to vector<2x32xf32>
    %256 = arith.mulf %255, %252 : vector<2x32xf32>
    %257 = arith.addf %254, %256 : vector<2x32xf32>
    %258 = vector.extract_strided_slice %250 {offsets = [0, 64], sizes = [2, 32], strides = [1, 1]} : vector<2x96xf32> to vector<2x32xf32>
    %259 = math.tanh %257 : vector<2x32xf32>
    %260 = arith.mulf %258, %259 : vector<2x32xf32>
    %261 = vector.extract_strided_slice %241 {offsets = [0, 128], sizes = [2, 128], strides = [1, 1]} : vector<2x256xf32> to vector<2x128xf32>
    %c0_54 = arith.constant 0 : index
    %c6 = arith.constant 6 : index
    %c0_55 = arith.constant 0 : index
    %262 = vector.load %arg11[%c0_54, %c6, %c0_55] : memref<2x8x128xf32, #tpu.memory_space<vmem>>, vector<2x1x128xf32>
    %263 = vector.shape_cast %262 : vector<2x1x128xf32> to vector<2x128xf32>
    %264 = arith.addf %263, %261 : vector<2x128xf32>
    %265 = vector.extract_strided_slice %264 {offsets = [0, 0], sizes = [2, 96], strides = [1, 1]} : vector<2x128xf32> to vector<2x96xf32>
    %266 = arith.negf %265 : vector<2x96xf32>
    %267 = math.exp %266 : vector<2x96xf32>
    %cst_56 = arith.constant 1.000000e+00 : f32
    %268 = vector.broadcast %cst_56 : f32 to vector<2x96xf32>
    %269 = arith.addf %268, %267 : vector<2x96xf32>
    %270 = arith.divf %268, %269 : vector<2x96xf32>
    %271 = vector.extract_strided_slice %264 {offsets = [0, 96], sizes = [2, 32], strides = [1, 1]} : vector<2x128xf32> to vector<2x32xf32>
    %272 = math.tanh %271 : vector<2x32xf32>
    %273 = vector.extract_strided_slice %270 {offsets = [0, 32], sizes = [2, 32], strides = [1, 1]} : vector<2x96xf32> to vector<2x32xf32>
    %274 = arith.mulf %273, %236 : vector<2x32xf32>
    %275 = vector.extract_strided_slice %270 {offsets = [0, 0], sizes = [2, 32], strides = [1, 1]} : vector<2x96xf32> to vector<2x32xf32>
    %276 = arith.mulf %275, %272 : vector<2x32xf32>
    %277 = arith.addf %274, %276 : vector<2x32xf32>
    %278 = vector.extract_strided_slice %270 {offsets = [0, 64], sizes = [2, 32], strides = [1, 1]} : vector<2x96xf32> to vector<2x32xf32>
    %279 = math.tanh %277 : vector<2x32xf32>
    %280 = arith.mulf %278, %279 : vector<2x32xf32>
    %cst_57 = arith.constant dense<0.000000e+00> : vector<2x128xf32>
    %281 = tpu.matmul %260, %10, %cst_57 {dimension_numbers = #tpu.dot_dimension_numbers<[1], [0], [0], [1], [0, 0, 1, 1], [], []>} : vector<2x32xf32>, vector<32x128xf32>, vector<2x128xf32> -> vector<2x128xf32>
    %cst_58 = arith.constant dense<0.000000e+00> : vector<2x256xf32>
    %282 = tpu.matmul %280, %9, %cst_58 {dimension_numbers = #tpu.dot_dimension_numbers<[1], [0], [0], [1], [0, 0, 1, 1], [], []>} : vector<2x32xf32>, vector<32x256xf32>, vector<2x256xf32> -> vector<2x256xf32>
    %283 = vector.extract_strided_slice %282 {offsets = [0, 0], sizes = [2, 128], strides = [1, 1]} : vector<2x256xf32> to vector<2x128xf32>
    %284 = arith.addf %283, %281 : vector<2x128xf32>
    %285 = arith.addf %284, %13 : vector<2x128xf32>
    %286 = vector.extract_strided_slice %285 {offsets = [0, 0], sizes = [2, 96], strides = [1, 1]} : vector<2x128xf32> to vector<2x96xf32>
    %287 = arith.negf %286 : vector<2x96xf32>
    %288 = math.exp %287 : vector<2x96xf32>
    %cst_59 = arith.constant 1.000000e+00 : f32
    %289 = vector.broadcast %cst_59 : f32 to vector<2x96xf32>
    %290 = arith.addf %289, %288 : vector<2x96xf32>
    %291 = arith.divf %289, %290 : vector<2x96xf32>
    %292 = vector.extract_strided_slice %285 {offsets = [0, 96], sizes = [2, 32], strides = [1, 1]} : vector<2x128xf32> to vector<2x32xf32>
    %293 = math.tanh %292 : vector<2x32xf32>
    %294 = vector.extract_strided_slice %291 {offsets = [0, 32], sizes = [2, 32], strides = [1, 1]} : vector<2x96xf32> to vector<2x32xf32>
    %295 = arith.mulf %294, %257 : vector<2x32xf32>
    %296 = vector.extract_strided_slice %291 {offsets = [0, 0], sizes = [2, 32], strides = [1, 1]} : vector<2x96xf32> to vector<2x32xf32>
    %297 = arith.mulf %296, %293 : vector<2x32xf32>
    %298 = arith.addf %295, %297 : vector<2x32xf32>
    %299 = vector.extract_strided_slice %291 {offsets = [0, 64], sizes = [2, 32], strides = [1, 1]} : vector<2x96xf32> to vector<2x32xf32>
    %300 = math.tanh %298 : vector<2x32xf32>
    %301 = arith.mulf %299, %300 : vector<2x32xf32>
    %302 = vector.extract_strided_slice %282 {offsets = [0, 128], sizes = [2, 128], strides = [1, 1]} : vector<2x256xf32> to vector<2x128xf32>
    %c0_60 = arith.constant 0 : index
    %c7 = arith.constant 7 : index
    %c0_61 = arith.constant 0 : index
    %303 = vector.load %arg11[%c0_60, %c7, %c0_61] : memref<2x8x128xf32, #tpu.memory_space<vmem>>, vector<2x1x128xf32>
    %304 = vector.shape_cast %303 : vector<2x1x128xf32> to vector<2x128xf32>
    %305 = arith.addf %304, %302 : vector<2x128xf32>
    %306 = vector.extract_strided_slice %305 {offsets = [0, 0], sizes = [2, 96], strides = [1, 1]} : vector<2x128xf32> to vector<2x96xf32>
    %307 = arith.negf %306 : vector<2x96xf32>
    %308 = math.exp %307 : vector<2x96xf32>
    %cst_62 = arith.constant 1.000000e+00 : f32
    %309 = vector.broadcast %cst_62 : f32 to vector<2x96xf32>
    %310 = arith.addf %309, %308 : vector<2x96xf32>
    %311 = arith.divf %309, %310 : vector<2x96xf32>
    %312 = vector.extract_strided_slice %305 {offsets = [0, 96], sizes = [2, 32], strides = [1, 1]} : vector<2x128xf32> to vector<2x32xf32>
    %313 = math.tanh %312 : vector<2x32xf32>
    %314 = vector.extract_strided_slice %311 {offsets = [0, 32], sizes = [2, 32], strides = [1, 1]} : vector<2x96xf32> to vector<2x32xf32>
    %315 = arith.mulf %314, %277 : vector<2x32xf32>
    %316 = vector.extract_strided_slice %311 {offsets = [0, 0], sizes = [2, 32], strides = [1, 1]} : vector<2x96xf32> to vector<2x32xf32>
    %317 = arith.mulf %316, %313 : vector<2x32xf32>
    %318 = arith.addf %315, %317 : vector<2x32xf32>
    %319 = vector.extract_strided_slice %311 {offsets = [0, 64], sizes = [2, 32], strides = [1, 1]} : vector<2x96xf32> to vector<2x32xf32>
    %320 = math.tanh %318 : vector<2x32xf32>
    %321 = arith.mulf %319, %320 : vector<2x32xf32>
    %cst_63 = arith.constant dense<0.000000e+00> : vector<2x128xf32>
    %322 = tpu.matmul %301, %10, %cst_63 {dimension_numbers = #tpu.dot_dimension_numbers<[1], [0], [0], [1], [0, 0, 1, 1], [], []>} : vector<2x32xf32>, vector<32x128xf32>, vector<2x128xf32> -> vector<2x128xf32>
    %cst_64 = arith.constant dense<0.000000e+00> : vector<2x256xf32>
    %323 = tpu.matmul %321, %9, %cst_64 {dimension_numbers = #tpu.dot_dimension_numbers<[1], [0], [0], [1], [0, 0, 1, 1], [], []>} : vector<2x32xf32>, vector<32x256xf32>, vector<2x256xf32> -> vector<2x256xf32>
    %324 = vector.extract_strided_slice %323 {offsets = [0, 0], sizes = [2, 128], strides = [1, 1]} : vector<2x256xf32> to vector<2x128xf32>
    %325 = arith.addf %324, %322 : vector<2x128xf32>
    %326 = arith.addf %325, %13 : vector<2x128xf32>
    %327 = vector.extract_strided_slice %326 {offsets = [0, 0], sizes = [2, 96], strides = [1, 1]} : vector<2x128xf32> to vector<2x96xf32>
    %328 = arith.negf %327 : vector<2x96xf32>
    %329 = math.exp %328 : vector<2x96xf32>
    %cst_65 = arith.constant 1.000000e+00 : f32
    %330 = vector.broadcast %cst_65 : f32 to vector<2x96xf32>
    %331 = arith.addf %330, %329 : vector<2x96xf32>
    %332 = arith.divf %330, %331 : vector<2x96xf32>
    %333 = vector.extract_strided_slice %326 {offsets = [0, 96], sizes = [2, 32], strides = [1, 1]} : vector<2x128xf32> to vector<2x32xf32>
    %334 = math.tanh %333 : vector<2x32xf32>
    %335 = vector.extract_strided_slice %332 {offsets = [0, 32], sizes = [2, 32], strides = [1, 1]} : vector<2x96xf32> to vector<2x32xf32>
    %336 = arith.mulf %335, %298 : vector<2x32xf32>
    %337 = vector.extract_strided_slice %332 {offsets = [0, 0], sizes = [2, 32], strides = [1, 1]} : vector<2x96xf32> to vector<2x32xf32>
    %338 = arith.mulf %337, %334 : vector<2x32xf32>
    %339 = arith.addf %336, %338 : vector<2x32xf32>
    %340 = vector.extract_strided_slice %332 {offsets = [0, 64], sizes = [2, 32], strides = [1, 1]} : vector<2x96xf32> to vector<2x32xf32>
    %341 = math.tanh %339 : vector<2x32xf32>
    %342 = arith.mulf %340, %341 : vector<2x32xf32>
    %c0_66 = arith.constant 0 : index
    %c0_67 = arith.constant 0 : index
    %c0_68 = arith.constant 0 : index
    %343 = vector.load %arg9[%c0_66, %c0_67, %c0_68] : memref<2x2x32xf32, #tpu.memory_space<vmem>>, vector<1x2x32xf32>
    %344 = vector.shape_cast %343 : vector<1x2x32xf32> to vector<2x32xf32>
    %345 = vector.shape_cast %321 : vector<2x32xf32> to vector<1x2x32xf32>
    tpu.vector_store %arg9[%c0_66, %c0_67, %c0_68], %345 {strides = array<i32>} : memref<2x2x32xf32, #tpu.memory_space<vmem>>, vector<1x2x32xf32>,
    %c1_69 = arith.constant 1 : index
    %c0_70 = arith.constant 0 : index
    %c0_71 = arith.constant 0 : index
    %346 = vector.load %arg9[%c1_69, %c0_70, %c0_71] : memref<2x2x32xf32, #tpu.memory_space<vmem>>, vector<1x2x32xf32>
    %347 = vector.shape_cast %346 : vector<1x2x32xf32> to vector<2x32xf32>
    %348 = vector.shape_cast %342 : vector<2x32xf32> to vector<1x2x32xf32>
    tpu.vector_store %arg9[%c1_69, %c0_70, %c0_71], %348 {strides = array<i32>} : memref<2x2x32xf32, #tpu.memory_space<vmem>>, vector<1x2x32xf32>,
    %c0_72 = arith.constant 0 : index
    %c0_73 = arith.constant 0 : index
    %c0_74 = arith.constant 0 : index
    %349 = vector.load %arg10[%c0_72, %c0_73, %c0_74] : memref<2x2x32xf32, #tpu.memory_space<vmem>>, vector<1x2x32xf32>
    %350 = vector.shape_cast %349 : vector<1x2x32xf32> to vector<2x32xf32>
    %351 = vector.shape_cast %318 : vector<2x32xf32> to vector<1x2x32xf32>
    tpu.vector_store %arg10[%c0_72, %c0_73, %c0_74], %351 {strides = array<i32>} : memref<2x2x32xf32, #tpu.memory_space<vmem>>, vector<1x2x32xf32>,
    %c1_75 = arith.constant 1 : index
    %c0_76 = arith.constant 0 : index
    %c0_77 = arith.constant 0 : index
    %352 = vector.load %arg10[%c1_75, %c0_76, %c0_77] : memref<2x2x32xf32, #tpu.memory_space<vmem>>, vector<1x2x32xf32>
    %353 = vector.shape_cast %352 : vector<1x2x32xf32> to vector<2x32xf32>
    %354 = vector.shape_cast %339 : vector<2x32xf32> to vector<1x2x32xf32>
    tpu.vector_store %arg10[%c1_75, %c0_76, %c0_77], %354 {strides = array<i32>} : memref<2x2x32xf32, #tpu.memory_space<vmem>>, vector<1x2x32xf32>,
    %355 = vector.shape_cast %55 : vector<2x32xf32> to vector<2x1x32xf32>
    %356 = vector.shape_cast %96 : vector<2x32xf32> to vector<2x1x32xf32>
    %357 = vector.shape_cast %137 : vector<2x32xf32> to vector<2x1x32xf32>
    %358 = vector.shape_cast %178 : vector<2x32xf32> to vector<2x1x32xf32>
    %359 = vector.shape_cast %219 : vector<2x32xf32> to vector<2x1x32xf32>
    %360 = vector.shape_cast %260 : vector<2x32xf32> to vector<2x1x32xf32>
    %361 = vector.shape_cast %301 : vector<2x32xf32> to vector<2x1x32xf32>
    %362 = vector.shape_cast %342 : vector<2x32xf32> to vector<2x1x32xf32>
    %363 = tpu.concatenate %355, %356, %357, %358, %359, %360, %361, %362 in 1 : vector<2x1x32xf32>, vector<2x1x32xf32>, vector<2x1x32xf32>, vector<2x1x32xf32>, vector<2x1x32xf32>, vector<2x1x32xf32>, vector<2x1x32xf32>, vector<2x1x32xf32> -> vector<2x8x32xf32>
    %c0_78 = arith.constant 0 : index
    %c0_79 = arith.constant 0 : index
    %364 = vector.load %arg6[%c0_78, %c0_79] : memref<1x32xf32, #tpu.memory_space<vmem>>, vector<1x32xf32>
    %365 = vector.shape_cast %364 : vector<1x32xf32> to vector<1x1x32xf32>
    %366 = vector.broadcast %365 : vector<1x1x32xf32> to vector<2x8x32xf32>
    %367 = arith.mulf %363, %366 : vector<2x8x32xf32>
    %cst_80 = arith.constant dense<0.000000e+00> : vector<2x8xf32>
    %368 = vector.multi_reduction <add>, %367, %cst_80 [2] : vector<2x8x32xf32> to vector<2x8xf32>
    %c0_81 = arith.constant 0 : index
    %c0_82 = arith.constant 0 : index
    %369 = vector.load %arg7[%c0_81, %c0_82] : memref<1x1xf32, #tpu.memory_space<vmem>>, vector<1x1xf32>
    %370 = vector.broadcast %369 : vector<1x1xf32> to vector<2x8xf32>
    %371 = arith.addf %368, %370 : vector<2x8xf32>
    %c0_83 = arith.constant 0 : index
    %c0_84 = arith.constant 0 : index
    %372 = vector.load %arg8[%c0_83, %c0_84] : memref<2x8xf32, #tpu.memory_space<vmem>>, vector<2x8xf32>
    tpu.vector_store %arg8[%c0_83, %c0_84], %371 {strides = array<i32>} : memref<2x8xf32, #tpu.memory_space<vmem>>, vector<2x8xf32>,
    return
  }
}

</mosaic_0001>

<bundles_post_ra>
// kernel: rnn_module_forward.1
= control target key start
LH: loop header
LB: loop body
LE: loop exit
PB: predicated region body
PF: predicated region fallthrough
CT: control target
= control target key end

     0   :  { %s3648_s0 = inlined_call_operand.vmem [shape: f32[2,8,4], index: 0, kind: input, shape index: {}]   ;;  %s3649_s1 = inlined_call_operand.vmem [shape: f32[4,128], index: 1, kind: input, shape index: {}]   ;;  %s3650_s2 = inlined_call_operand.vmem [shape: f32[1,128], index: 2, kind: input, shape index: {}]   ;;  %s3651_s3 = inlined_call_operand.hbm [shape: f32[32,256], index: 3, kind: input, shape index: {}]   ;;  %s3652_s4 = inlined_call_operand.vmem [shape: f32[32,128], index: 4, kind: input, shape index: {}]   ;;  %s3653_s5 = inlined_call_operand.vmem [shape: f32[1,128], index: 5, kind: input, shape index: {}]   ;;  %s3654_s6 = inlined_call_operand.hbm [shape: f32[1,32], index: 6, kind: input, shape index: {}]   ;;  %s3655_s7 = inlined_call_operand.<no memory space> [shape: f32[1,1], index: 7, kind: input, shape index: {}]   ;;  %s3656_s8 = inlined_call_operand.hbm [shape: f32[2,8], index: 8, kind: output, shape index: {0}]   ;;  %s3657_s9 = inlined_call_operand.hbm [shape: f32[2,2,32], index: 9, kind: output, shape index: {1}]   ;;  %s3658_s10 = inlined_call_operand.hbm [shape: f32[2,2,32], index: 10, kind: output, shape index: {2}]  }
   0x1   :  { %v16_v0 = vstv %s3655_s7 }
   0x2   :  { %17 = vst [vmem:[#allocation3] sm:$0x1] %v16_v0 }
   0x3   :  { %18 = vsyncpa [#allocation5], 0 }
   0x4   :  { %19 = vsyncpa [#allocation8], 0 }
   0x5   :  { %20 = vsyncpa [#allocation6], 0 }
   0x6   :  { %21 = vsyncpa [#allocation11], 0  ;;  %s3075_s15 = smov [#allocation4]   ;;  %s2957_s19 = scalar_lea.hbm %s3651_s3, 1024 }
   0x7   :  { %s33_s16 = sshll.u32 %s3075_s15, 4  ;;  %p2958_p0 = scmp.ne.s32.totalorder %s3651_s3, %s2957_s19  ;;  %s34_s16 = int_to_ptr.vmem [resolvable:$true] %s33_s16 }
   0x8   :  { %p2961_p1 = scmp.lt.u32.totalorder %s2957_s19, %s3651_s3 }
   0xa   :  { %p2963_p2 = pnand %p2961_p1, %p2958_p0 }
   0xc   :  { %2966 = shalt.err (!%p2963_p2)
}
   0xd   :  { %s2967_s7 = scalar_lea.vmem %s34_s16, 1024  ;;  %p2972_p4 = scmp.lt.s32.totalorder %s34_s16, %s34_s16 }
   0xe   :  { %p2968_p3 = scmp.ne.s32.totalorder %s34_s16, %s2967_s7  ;;  %p2973_p5 = scmp.lt.s32.totalorder %s2967_s7, %s2967_s7 }
  0x10   :  { %p2974_p6 = por %p2973_p5, %p2972_p4 }
  0x12   :  { %p2975_p7 = pnand %p2974_p6, %p2968_p3 }
  0x14   :  { %2978 = shalt.err (!%p2975_p7)
}
  0x15   :  { %s3076_s24 = smov 256   ;;  %s3077_s25 = smov 16  }
  0x16   :  { %39 = dma.hbm_to_vmem [thread:$0]  %s3651_s3, 1024, %s34_s16, [#allocation5], %s3076_s24, %s3076_s24, %s3077_s25  }
  0x17   :  { %s3078_s28 = smov [#allocation7]   ;;  %s2979_s12 = scalar_lea.hbm %s3654_s6, 16 }
  0x18   :  { %s50_s29 = sshll.u32 %s3078_s28, 4  ;;  %p2980_p8 = scmp.ne.s32.totalorder %s3654_s6, %s2979_s12  ;;  %s51_s29 = int_to_ptr.vmem [resolvable:$true] %s50_s29 }
  0x19   :  { %p2983_p9 = scmp.lt.u32.totalorder %s2979_s12, %s3654_s6 }
  0x1b   :  { %p2985_p10 = pnand %p2983_p9, %p2980_p8 }
  0x1d   :  { %2988 = shalt.err (!%p2985_p10)
}
  0x1e   :  { %s2989_s18 = scalar_lea.vmem %s51_s29, 16  ;;  %s2993_s3 = scalar_lea.vmem %s51_s29, 32 }
  0x1f   :  { %p2990_p11 = scmp.ne.s32.totalorder %s51_s29, %s2989_s18  ;;  %p2994_p12 = scmp.lt.s32.totalorder %s51_s29, %s51_s29 }
  0x20   :  { %p2995_p13 = scmp.lt.s32.totalorder %s2993_s3, %s2989_s18 }
  0x22   :  { %p2996_p0 = por %p2995_p13, %p2994_p12 }
  0x24   :  { %p2997_p1 = pnand %p2996_p0, %p2990_p11 }
  0x26   :  { %3000 = shalt.err (!%p2997_p1)
}
  0x27   :  { %53 = dma.hbm_to_vmem [thread:$0]  %s3654_s6, 16, %s51_s29, [#allocation8]  }
  0x28   :  { %3067 = dma.done.wait [#allocation5], 1024  }
  0x29   :  { %3068 = vsyncadd [#allocation5], 4294966272 }
  0x2a   :  { %3069 = dma.done.wait [#allocation8], 16  }
  0x2b   :  { %3070 = vsyncadd [#allocation8], 4294967280  ;;  %vm79_vm0 = vcmask 1043456   ;;  %vm72_vm1 = vcmask 31744   ;;  %v64_v1 = vld [vmem:[%s3649_s1] sm:$0xf] }
  0x2c   :  { %v62_v2 = vld [vmem:[%s3648_s0] sm:$0xff]  ;;  %v63_v3 = vld [vmem:[%s3648_s0 + $0x8] sm:$0xff]  ;;  %2542 = vmatprep.subr.msk.mxu0 %vm79_vm0, %v64_v1  ;;  %s3079_s0 = smov 32   ;;  %v3080_v34 = vmov 0.0|0.0   ;;  %v160_v37 = vld [vmem:[#allocation4] sm:$0xff]  ;;  %vm3081_vm2 = vmmov 0  }
  0x2d   :  { %2544 = vmatprep.mubr.msk.f32.mxu0 %vm72_vm1, %v62_v2  ;;  %2543 = vmatpush3.msk.msra.mxu0 %vm79_vm0, %v64_v1  ;;  %v2453_v4 = vld [vmem:[%s3650_s2] ss:$0 sm:$0xff]  ;;  %v163_v32 = vld [vmem:[#allocation4 + $0x18] sm:$0xff]  ;;  %v162_v38 = vld [vmem:[#allocation4 + $0x10] sm:$0xff]  ;;  %v3082_v39 = vmov 0.0   ;;  %vm308_vm3 = vcmask 1041409  }
  0x2e   :  { %2545 = vmatmul.mubr.msk.f32.vlgmr.msra.gmra.mrb[0].mxu0 %vm72_vm1, %v63_v3  ;;  %v161_v31 = vld [vmem:[#allocation4 + $0x8] sm:$0xff]  ;;  %2635 = vmatprep.subr.bf16.mxu1 %v3080_v34  ;;  %v169_v36 = vld [vmem:[%s3652_s4 + $0x8] sm:$0xff]  ;;  %v3210_v41 = vpack.c.bf16 %v162_v38, %v160_v37  ;;  %v170_v44 = vld [vmem:[%s3652_s4 + $0x10] sm:$0xff]  ;;  %vm231_vm4 = vcmask 261120   ;;  %vm2333_vm5 = vcmask 1040384   ;;  %vm2336_vm6 = vcmask 1041408  }
  0x2f   :  { %v168_v33 = vld [vmem:[%s3652_s4] sm:$0xff]  ;;  %v3201_v35 = vpack.c.bf16 %v163_v32, %v161_v31  ;;  %2555 = vmatprep.mubr.msk.f32.mxu1 %vm3081_vm2, %v3082_v39  ;;  %v167_v43 = vld [vmem:[#allocation4 + $0x38] sm:$0xff]  ;;  %378 = vmatprep.mubr.f32.mxu0 %v3082_v39  ;;  %v171_v46 = vld [vmem:[%s3652_s4 + $0x18] sm:$0xff]  ;;  %s3083_s4 = smov 64   ;;  %vm2339_vm7 = vcmask 1042432   ;;  %vm2344_vm8 = vcmask 1044480  }
  0x30   :  { %v3208_v40 = vpack.c.bf16 %v169_v36, %v168_v33  ;;  %v165_v42 = vld [vmem:[#allocation4 + $0x28] sm:$0xff]  ;;  %v164_v47 = vld [vmem:[#allocation4 + $0x20] sm:$0xff]  ;;  %v166_v48 = vld [vmem:[#allocation4 + $0x30] sm:$0xff]  ;;  %v3224_v49 = vpack.c.bf16 %v171_v46, %v170_v44  ;;  %vm2347_vm9 = vcmask 1045504   ;;  %vm2063_vm10 = vcmask 254976   ;;  %s3087_s17 = smov [#allocation10]  }
  0x31   :  { %2642 = vmatprep.subr.bf16.mxu0 %v3201_v35  ;;  %v3217_v45 = vpack.c.bf16 %v167_v43, %v165_v42  ;;  %v3226_v50 = vpack.c.bf16 %v166_v48, %v164_v47  ;;  %vm2350_vm11 = vcmask 1046528   ;;  %s2421_s18 = sshll.u32 %s3087_s17, 4  ;;  %s2422_s18 = int_to_ptr.vmem [resolvable:$true] %s2421_s18 }
  0x32   :  { %2637 = vmatpush3.bf16.msra.mxu1 %v3208_v40  ;;  %2644 = vmatpush1.bf16.msra.mxu0 %v3210_v41  ;;  %s3001_s3 = scalar_lea.vmem %s2422_s18, 64  ;;  %p3006_p3 = scmp.lt.s32.totalorder %s2422_s18, %s2422_s18 }
  0x33   :  { %2638 = vmatprep.subr.bf16.mxu1 %v3080_v34  ;;  %2646 = vmatprep.subr.bf16.mxu0 %v3217_v45  ;;  %p3002_p2 = scmp.ne.s32.totalorder %s2422_s18, %s3001_s3  ;;  %p3007_p4 = scmp.lt.s32.totalorder %s3001_s3, %s3001_s3 }
  0x35   :  { %p3008_p5 = por %p3007_p4, %p3006_p3 }
  0x36   :  { %2640 = vmatpush3.bf16.msra.mxu1 %v3224_v49  ;;  %2648 = vmatpush1.bf16.msra.mxu0 %v3226_v50 }
  0x37   :  { %2656 = vmatprep.subr.bf16.mxu0 %v3201_v35  ;;  %2649 = vmatprep.subr.bf16.mxu1 %v3080_v34  ;;  %p3009_p6 = pnand %p3008_p5, %p3002_p2 }
  0x39   :  { %2556 = vmatmul.mubr.f32.vlgmr.msra.gmra.mrb[0].mxu1 %v3082_v39 }
  0x3a   :  { %2651 = vmatpush3.bf16.msra.mxu1 %v3208_v40  ;;  %2566 = vmatprep.mubr.msk.f32.mxu1 %vm3081_vm2, %v3082_v39 }
  0x3b   :  { %2652 = vmatprep.subr.bf16.mxu1 %v3080_v34 }
  0x3e   :  { %2654 = vmatpush3.bf16.msra.mxu1 %v3224_v49 }
  0x3f   :  { %2663 = vmatprep.subr.bf16.mxu1 %v3080_v34 }
 0x101   :  { %v2546_v5 = vpop.f32.mrb[0].mxu0 }
 0x102   :  { %v155_v6 = vadd.f32 %v2546_v5, %v2453_v4  ;;  %v149_v7 = vpop.f32.mrb[1].mxu0 }
 0x103   :  { %v150_v8 = vadd.f32 %v2453_v4, %v149_v7 }
 0x104   :  { %159 = vst [vmem:[#allocation2 + $0x8] sm:$0xff] %v155_v6  ;;  %v3254_v6 = vld [vmem:[%s3653_s5] ss:$0 sm:$0xff] }
 0x105   :  { %158 = vst [vmem:[#allocation2] sm:$0xff] %v150_v8 }
 0x10b   :  { %v180_v9 = vld [vmem:[#allocation2 + $0x8] sm:$0x1]  ;;  %v412_v4 = vld [vmem:[#allocation2 + $0x9] sm:$0x1] }
 0x10c   :  { %2764 = vtanh.f32 %v180_v9  ;;  %v179_v10 = vld [vmem:[#allocation2] sm:$0x1]  ;;  %v2459_v13 = vmul.f32 -1.442695, %v180_v9  ;;  %v301_v59 = vpop.f32.mrb[0].mxu1 }
 0x10d   :  { %2766 = vtanh.f32 %v179_v10  ;;  %v2458_v14 = vmul.f32 -1.442695, %v179_v10  ;;  %v2557_v60 = vpop.f32.mrb[1].mxu1  ;;  %v411_v1 = vld [vmem:[#allocation2 + $0x1] sm:$0x1] }
 0x10e   :  { %2768 = vpow2.f32 %v2459_v13 }
 0x10f   :  { %2770 = vpow2.f32 %v2458_v14 }
 0x116   :  { %v2765_v11 = vpop.eup %2764 }
 0x117   :  { %203 = vrot.lane.b32.xlu0 %v2765_v11, %s3079_s0  ;;  %v2767_v12 = vpop.eup %2766 }
 0x118   :  { %v2769_v15 = vpop.eup %2768 }
 0x119   :  { %v190_v16 = vadd.f32 1.0, %v2769_v15  ;;  %v2771_v17 = vpop.eup %2770 }
 0x11a   :  { %v189_v18 = vadd.f32 1.0, %v2771_v17 }
 0x11b   :  { %201 = vrot.lane.b32.xlu0 %v2767_v12, %s3079_s0  ;;  %2772 = vrcp.f32 %v190_v16 }
 0x11c   :  { %2774 = vrcp.f32 %v189_v18 }
 0x125   :  { %v2773_v19 = vpop.eup %2772 }
 0x126   :  { %v2775_v22 = vpop.eup %2774  ;;  %v198_v25 = vmul.f32 0.0, %v2773_v19 }
 0x127   :  { %v197_v28 = vmul.f32 0.0, %v2775_v22 }
 0x189   :  { %v204_v20 = vpop.permute.xlu0 %203 }
 0x18a   :  { %v208_v21 = vmul.f32 %v2773_v19, %v204_v20 }
 0x18c   :  { %213 = vrot.lane.b32.xlu1 %v208_v21, %s3079_s0 }
 0x18d   :  { %v202_v23 = vpop.permute.xlu0 %201 }
 0x18e   :  { %v207_v24 = vmul.f32 %v2775_v22, %v202_v23 }
 0x190   :  { %211 = vrot.lane.b32.xlu1 %v207_v24, %s3079_s0 }
 0x1fe   :  { %v214_v26 = vpop.permute.xlu1 %213 }
 0x1ff   :  { %v3191_v27 = vadd.f32 %v214_v26, %v198_v25 }
 0x201   :  { %2776 = vtanh.f32 %v3191_v27 }
 0x202   :  { %v212_v29 = vpop.permute.xlu1 %211 }
 0x203   :  { %v3194_v30 = vadd.f32 %v212_v29, %v197_v28 }
 0x205   :  { %2778 = vtanh.f32 %v3194_v30 }
 0x20b   :  { %v2777_v51 = vpop.eup %2776 }
 0x20c   :  { %225 = vrot.lane.b32.xlu0 %v2777_v51, %s3079_s0 }
 0x20f   :  { %v2779_v52 = vpop.eup %2778 }
 0x210   :  { %223 = vrot.lane.b32.xlu1 %v2779_v52, %s3079_s0 }
 0x27e   :  { %v226_v53 = vpop.permute.xlu0 %225 }
 0x27f   :  { %v230_v54 = vmul.f32 %v2773_v19, %v226_v53 }
 0x281   :  { %v307_v56 = vrot.slane %v230_v54, 7 }
 0x282   :  { %v224_v55 = vpop.permute.xlu1 %223 }
 0x283   :  { %v229_v57 = vmul.f32 %v2775_v22, %v224_v55 }
 0x285   :  { %v309_v58 = vsel %vm308_vm3, %v307_v56, %v229_v57 }
 0x286   :  { %310 = vrot.lane.b32.xlu0 %v309_v58, %s3083_s4 }
 0x2f8   :  { %v311_v61 = vpop.permute.xlu0 %310 }
 0x2f9   :  { %2460 = vmatmul.mubr.msk.f32.vlgmr.msra.gmra.mrb[2].mxu0 %vm231_vm4, %v311_v61 }
 0x2fa   :  { %2658 = vmatpush1.bf16.msra.mxu0 %v3210_v41  ;;  %614 = vmatprep.mubr.f32.mxu0 %v3082_v39 }
 0x2fb   :  { %2660 = vmatprep.subr.bf16.mxu0 %v3217_v45 }
 0x2fe   :  { %2662 = vmatpush1.bf16.msra.mxu0 %v3226_v50 }
 0x2ff   :  { %2670 = vmatprep.subr.bf16.mxu0 %v3201_v35 }
 0x3cc   :  { %v380_v62 = vpop.f32.mrb[2].mxu0 }
 0x3cd   :  { %v385_v63 = vadd.f32 %v380_v62, %v301_v59  ;;  %v382_v0 = vpop.f32.mrb[3].mxu0  ;;  %v647_v62 = vld [vmem:[#allocation2 + $0x2] sm:$0x1] }
 0x3ce   :  { %v414_v2 = vrot.slane %v382_v0, 1  ;;  %v417_v3 = vadd.f32 %v411_v1, %v382_v0 }
 0x3cf   :  { %v386_v7 = vadd.f32 %v3254_v6, %v385_v63 }
 0x3d0   :  { %2780 = vtanh.f32 %v417_v3  ;;  %v418_v5 = vadd.f32 %v414_v2, %v412_v4  ;;  %v2462_v11 = vmul.f32 -1.442695, %v417_v3  ;;  %v648_v3 = vld [vmem:[#allocation2 + $0xa] sm:$0x1] }
 0x3d1   :  { %v2461_v13 = vmul.f32 -1.442695, %v386_v7 }
 0x3d2   :  { %2782 = vtanh.f32 %v418_v5  ;;  %v2463_v12 = vmul.f32 -1.442695, %v418_v5 }
 0x3d3   :  { %2784 = vtanh.f32 %v386_v7 }
 0x3d4   :  { %2786 = vpow2.f32 %v2462_v11 }
 0x3d5   :  { %2788 = vpow2.f32 %v2463_v12 }
 0x3d6   :  { %2790 = vpow2.f32 %v2461_v13 }
 0x3da   :  { %v2781_v8 = vpop.eup %2780 }
 0x3db   :  { %437 = vrot.lane.b32.xlu0 %v2781_v8, %s3079_s0 }
 0x3dc   :  { %v2783_v9 = vpop.eup %2782 }
 0x3dd   :  { %439 = vrot.lane.b32.xlu1 %v2783_v9, %s3079_s0  ;;  %v2785_v10 = vpop.eup %2784 }
 0x3de   :  { %v2787_v14 = vpop.eup %2786 }
 0x3df   :  { %v425_v15 = vadd.f32 1.0, %v2787_v14  ;;  %v2789_v16 = vpop.eup %2788 }
 0x3e0   :  { %v426_v17 = vadd.f32 1.0, %v2789_v16  ;;  %v2791_v18 = vpop.eup %2790 }
 0x3e1   :  { %396 = vrot.lane.b32.xlu1 %v2785_v10, %s3079_s0  ;;  %2792 = vrcp.f32 %v425_v15  ;;  %v390_v19 = vadd.f32 1.0, %v2791_v18 }
 0x3e2   :  { %2794 = vrcp.f32 %v426_v17 }
 0x3e3   :  { %2796 = vrcp.f32 %v390_v19 }
 0x3eb   :  { %v2793_v20 = vpop.eup %2792 }
 0x3ec   :  { %v2795_v23 = vpop.eup %2794  ;;  %v433_v31 = vmul.f32 %v2793_v20, %v3194_v30 }
 0x3ed   :  { %v2797_v26 = vpop.eup %2796  ;;  %v434_v36 = vmul.f32 %v2795_v23, %v3191_v27 }
 0x3ee   :  { %v394_v42 = vmul.f32 0.0, %v2797_v26 }
 0x44d   :  { %v438_v21 = vpop.permute.xlu0 %437 }
 0x44e   :  { %v443_v22 = vmul.f32 %v2793_v20, %v438_v21 }
 0x44f   :  { %v440_v24 = vpop.permute.xlu1 %439 }
 0x450   :  { %447 = vrot.lane.b32.xlu1 %v443_v22, %s3079_s0  ;;  %v444_v25 = vmul.f32 %v2795_v23, %v440_v24 }
 0x452   :  { %449 = vrot.lane.b32.xlu0 %v444_v25, %s3079_s0 }
 0x453   :  { %v397_v28 = vpop.permute.xlu1 %396 }
 0x454   :  { %v399_v29 = vmul.f32 %v2797_v26, %v397_v28 }
 0x456   :  { %401 = vrot.lane.b32.xlu0 %v399_v29, %s3079_s0 }
 0x4c2   :  { %v448_v32 = vpop.permute.xlu1 %447 }
 0x4c3   :  { %v3264_v33 = vadd.f32 %v448_v32, %v433_v31 }
 0x4c4   :  { %v450_v37 = vpop.permute.xlu0 %449 }
 0x4c5   :  { %2798 = vtanh.f32 %v3264_v33  ;;  %v3268_v38 = vadd.f32 %v450_v37, %v434_v36 }
 0x4c7   :  { %2800 = vtanh.f32 %v3268_v38 }
 0x4c8   :  { %v402_v43 = vpop.permute.xlu0 %401 }
 0x4c9   :  { %v3271_v44 = vadd.f32 %v402_v43, %v394_v42 }
 0x4cb   :  { %2802 = vtanh.f32 %v3271_v44 }
 0x4cf   :  { %v2799_v46 = vpop.eup %2798 }
 0x4d0   :  { %459 = vrot.lane.b32.xlu0 %v2799_v46, %s3079_s0 }
 0x4d1   :  { %v2801_v30 = vpop.eup %2800 }
 0x4d2   :  { %461 = vrot.lane.b32.xlu1 %v2801_v30, %s3079_s0 }
 0x4d5   :  { %v2803_v47 = vpop.eup %2802 }
 0x4d6   :  { %407 = vrot.lane.b32.xlu1 %v2803_v47, %s3079_s0 }
 0x542   :  { %v460_v27 = vpop.permute.xlu0 %459 }
 0x543   :  { %v465_v52 = vmul.f32 %v2793_v20, %v460_v27 }
 0x544   :  { %v462_v48 = vpop.permute.xlu1 %461 }
 0x545   :  { %v466_v51 = vmul.f32 %v2795_v23, %v462_v48 }
 0x547   :  { %v544_v53 = vrot.slane %v466_v51, 7  ;;  %v2088_v51 = vlaneseq }
 0x548   :  { %v408_v54 = vpop.permute.xlu1 %407 }
 0x549   :  { %v3277_v55 = vmul.f32 %v2797_v26, %v408_v54  ;;  %v545_v56 = vsel %vm308_vm3, %v544_v53, %v465_v52 }
 0x54a   :  { %546 = vrot.lane.b32.xlu0 %v545_v56, %s3083_s4 }
 0x54b   :  { %468 = vrot.lane.b32.xlu1 %v3277_v55, %s3083_s4 }
 0x5bc   :  { %v547_v57 = vpop.permute.xlu0 %546 }
 0x5bd   :  { %2465 = vmatmul.mubr.msk.f32.vlgmr.msra.gmra.mrb[4].mxu0 %vm231_vm4, %v547_v57  ;;  %v469_v58 = vpop.permute.xlu1 %468 }
 0x5be   :  { %2567 = vmatmul.mubr.msk.f32.vlgmr.msra.gmra.mrb[2].mxu1 %vm231_vm4, %v469_v58  ;;  %2672 = vmatpush1.bf16.msra.mxu0 %v3210_v41 }
 0x5bf   :  { %2665 = vmatpush3.bf16.msra.mxu1 %v3208_v40  ;;  %2674 = vmatprep.subr.bf16.mxu0 %v3217_v45 }
 0x5c0   :  { %2666 = vmatprep.subr.bf16.mxu1 %v3080_v34  ;;  %850 = vmatprep.mubr.f32.mxu0 %v3082_v39 }
 0x5c1   :  { %2577 = vmatprep.mubr.msk.f32.mxu1 %vm3081_vm2, %v3082_v39 }
 0x5c2   :  { %2676 = vmatpush1.bf16.msra.mxu0 %v3226_v50 }
 0x5c3   :  { %2668 = vmatpush3.bf16.msra.mxu1 %v3224_v49  ;;  %2684 = vmatprep.subr.bf16.mxu0 %v3201_v35 }
 0x5c4   :  { %2677 = vmatprep.subr.bf16.mxu1 %v3080_v34 }
 0x690   :  { %v616_v59 = vpop.f32.mrb[4].mxu0 }
 0x691   :  { %v538_v60 = vpop.f32.mrb[2].mxu1  ;;  %v618_v61 = vpop.f32.mrb[5].mxu0 }
 0x692   :  { %v621_v63 = vadd.f32 %v616_v59, %v538_v60  ;;  %v650_v0 = vrot.slane %v618_v61, 1  ;;  %v653_v1 = vadd.f32 %v647_v62, %v618_v61  ;;  %v2568_v2 = vpop.f32.mrb[3].mxu1 }
 0x694   :  { %2804 = vtanh.f32 %v653_v1  ;;  %v654_v4 = vadd.f32 %v650_v0, %v648_v3  ;;  %v622_v5 = vadd.f32 %v3254_v6, %v621_v63  ;;  %v2467_v10 = vmul.f32 -1.442695, %v653_v1 }
 0x696   :  { %2806 = vtanh.f32 %v654_v4  ;;  %v2468_v11 = vmul.f32 -1.442695, %v654_v4  ;;  %v2466_v12 = vmul.f32 -1.442695, %v622_v5 }
 0x697   :  { %2808 = vtanh.f32 %v622_v5 }
 0x698   :  { %2810 = vpow2.f32 %v2467_v10 }
 0x699   :  { %2812 = vpow2.f32 %v2468_v11 }
 0x69a   :  { %2814 = vpow2.f32 %v2466_v12 }
 0x69e   :  { %v2805_v7 = vpop.eup %2804 }
 0x69f   :  { %673 = vrot.lane.b32.xlu1 %v2805_v7, %s3079_s0 }
 0x6a0   :  { %v2807_v8 = vpop.eup %2806 }
 0x6a1   :  { %675 = vrot.lane.b32.xlu0 %v2807_v8, %s3079_s0  ;;  %v2809_v9 = vpop.eup %2808 }
 0x6a2   :  { %v2811_v13 = vpop.eup %2810 }
 0x6a3   :  { %v661_v14 = vadd.f32 1.0, %v2811_v13  ;;  %v2813_v15 = vpop.eup %2812 }
 0x6a4   :  { %v662_v16 = vadd.f32 1.0, %v2813_v15  ;;  %v2815_v17 = vpop.eup %2814 }
 0x6a5   :  { %632 = vrot.lane.b32.xlu0 %v2809_v9, %s3079_s0  ;;  %2816 = vrcp.f32 %v661_v14  ;;  %v626_v18 = vadd.f32 1.0, %v2815_v17  ;;  %v883_v17 = vld [vmem:[#allocation2 + $0x3] sm:$0x1] }
 0x6a6   :  { %2818 = vrcp.f32 %v662_v16 }
 0x6a7   :  { %2820 = vrcp.f32 %v626_v18 }
 0x6af   :  { %v2817_v19 = vpop.eup %2816 }
 0x6b0   :  { %v2819_v22 = vpop.eup %2818  ;;  %v669_v29 = vmul.f32 %v2817_v19, %v3264_v33 }
 0x6b1   :  { %v2821_v25 = vpop.eup %2820  ;;  %v670_v36 = vmul.f32 %v2819_v22, %v3268_v38  ;;  %v3084_v38 = vmov 1966171168  }
 0x6b2   :  { %v630_v43 = vmul.f32 %v2821_v25, %v3271_v44  ;;  %v2086_v48 = vunpack.c.l.s4 %v3084_v38  ;;  %v3319_v44 = vshrl.u32 %v2088_v51, 7 }
 0x6b4   :  { %v2087_v52 = vunpack.c.0.s8 %v2086_v48  ;;  %v3329_v0 = vsub.s32 0, %v3319_v44 }
 0x6b6   :  { %v3322_v56 = vsub.s32 %v2087_v52, %v3319_v44 }
 0x6b8   :  { %v2091_v61 = vrot.slane %v3277_v55, %v3322_v56 }
 0x6ba   :  { %v2092_v2 = vcombine.high %v2091_v61, %v2091_v61  ;;  %v2099_v5 = vrot.slane %v2091_v61, %v3322_v56 }
 0x6bc   :  { %v2106_v8 = vrot.slane %v2092_v2, %v3322_v56 }
 0x711   :  { %v674_v20 = vpop.permute.xlu1 %673 }
 0x712   :  { %v679_v21 = vmul.f32 %v2817_v19, %v674_v20 }
 0x713   :  { %v676_v23 = vpop.permute.xlu0 %675 }
 0x714   :  { %683 = vrot.lane.b32.xlu0 %v679_v21, %s3079_s0  ;;  %v680_v24 = vmul.f32 %v2819_v22, %v676_v23 }
 0x716   :  { %685 = vrot.lane.b32.xlu1 %v680_v24, %s3079_s0 }
 0x717   :  { %v633_v26 = vpop.permute.xlu0 %632 }
 0x718   :  { %v635_v28 = vmul.f32 %v2821_v25, %v633_v26 }
 0x71a   :  { %637 = vrot.lane.b32.xlu1 %v635_v28, %s3079_s0 }
 0x786   :  { %v684_v31 = vpop.permute.xlu0 %683 }
 0x787   :  { %v3304_v32 = vadd.f32 %v684_v31, %v669_v29 }
 0x788   :  { %v686_v37 = vpop.permute.xlu1 %685 }
 0x789   :  { %2822 = vtanh.f32 %v3304_v32  ;;  %v3308_v42 = vadd.f32 %v686_v37, %v670_v36 }
 0x78b   :  { %2824 = vtanh.f32 %v3308_v42 }
 0x78c   :  { %v638_v46 = vpop.permute.xlu1 %637 }
 0x78d   :  { %v3312_v30 = vadd.f32 %v638_v46, %v630_v43 }
 0x78f   :  { %2826 = vtanh.f32 %v3312_v30 }
 0x793   :  { %v2823_v47 = vpop.eup %2822 }
 0x794   :  { %695 = vrot.lane.b32.xlu1 %v2823_v47, %s3079_s0 }
 0x795   :  { %v2825_v33 = vpop.eup %2824 }
 0x796   :  { %697 = vrot.lane.b32.xlu0 %v2825_v33, %s3079_s0 }
 0x799   :  { %v2827_v27 = vpop.eup %2826 }
 0x79a   :  { %643 = vrot.lane.b32.xlu0 %v2827_v27, %s3079_s0 }
 0x806   :  { %v696_v53 = vpop.permute.xlu1 %695 }
 0x807   :  { %v701_v58 = vmul.f32 %v2817_v19, %v696_v53 }
 0x808   :  { %v698_v54 = vpop.permute.xlu0 %697 }
 0x809   :  { %v702_v57 = vmul.f32 %v2819_v22, %v698_v54  ;;  %v884_v22 = vld [vmem:[#allocation2 + $0xb] sm:$0x1] }
 0x80b   :  { %v780_v59 = vrot.slane %v702_v57, 7 }
 0x80c   :  { %v644_v60 = vpop.permute.xlu0 %643 }
 0x80d   :  { %v646_v62 = vmul.f32 %v2821_v25, %v644_v60  ;;  %v781_v63 = vsel %vm308_vm3, %v780_v59, %v701_v58 }
 0x80e   :  { %782 = vrot.lane.b32.xlu1 %v781_v63, %s3083_s4 }
 0x80f   :  { %v2115_v1 = vrot.slane %v646_v62, %v3322_v56  ;;  %704 = vrot.lane.b32.xlu0 %v646_v62, %s3083_s4 }
 0x811   :  { %v2116_v3 = vcombine.high %v2115_v1, %v2115_v1  ;;  %v2123_v4 = vrot.slane %v2115_v1, %v3322_v56 }
 0x813   :  { %v2130_v55 = vrot.slane %v2116_v3, %v3322_v56  ;;  %v2266_v7 = vrot.slane %v2123_v4, %v3329_v0 }
 0x815   :  { %v2270_v9 = vrot.slane %v2130_v55, %v3329_v0  ;;  %v3339_v10 = vsel %vm2333_vm5, %v2099_v5, %v2266_v7 }
 0x817   :  { %v3341_v11 = vsel %vm2333_vm5, %v2106_v8, %v2270_v9 }
 0x880   :  { %v783_v12 = vpop.permute.xlu1 %782 }
 0x881   :  { %v705_v13 = vpop.permute.xlu0 %704  ;;  %2470 = vmatmul.mubr.msk.f32.vlgmr.msra.gmra.mrb[6].mxu0 %vm231_vm4, %v783_v12 }
 0x882   :  { %2578 = vmatmul.mubr.msk.f32.vlgmr.msra.gmra.mrb[4].mxu1 %vm231_vm4, %v705_v13  ;;  %2686 = vmatpush1.bf16.msra.mxu0 %v3210_v41 }
 0x883   :  { %2679 = vmatpush3.bf16.msra.mxu1 %v3208_v40  ;;  %2688 = vmatprep.subr.bf16.mxu0 %v3217_v45 }
 0x884   :  { %2680 = vmatprep.subr.bf16.mxu1 %v3080_v34  ;;  %1086 = vmatprep.mubr.f32.mxu0 %v3082_v39 }
 0x885   :  { %2588 = vmatprep.mubr.msk.f32.mxu1 %vm3081_vm2, %v3082_v39 }
 0x886   :  { %2690 = vmatpush1.bf16.msra.mxu0 %v3226_v50 }
 0x887   :  { %2682 = vmatpush3.bf16.msra.mxu1 %v3224_v49  ;;  %2698 = vmatprep.subr.bf16.mxu0 %v3201_v35 }
 0x888   :  { %2691 = vmatprep.subr.bf16.mxu1 %v3080_v34 }
 0x954   :  { %v852_v14 = vpop.f32.mrb[6].mxu0 }
 0x955   :  { %v774_v15 = vpop.f32.mrb[4].mxu1  ;;  %v854_v16 = vpop.f32.mrb[7].mxu0 }
 0x956   :  { %v857_v18 = vadd.f32 %v852_v14, %v774_v15  ;;  %v886_v19 = vrot.slane %v854_v16, 1  ;;  %v889_v20 = vadd.f32 %v883_v17, %v854_v16  ;;  %v2579_v21 = vpop.f32.mrb[5].mxu1 }
 0x958   :  { %2828 = vtanh.f32 %v889_v20  ;;  %v890_v23 = vadd.f32 %v886_v19, %v884_v22  ;;  %v858_v24 = vadd.f32 %v3254_v6, %v857_v18  ;;  %v2472_v29 = vmul.f32 -1.442695, %v889_v20 }
 0x95a   :  { %2830 = vtanh.f32 %v890_v23  ;;  %v2473_v31 = vmul.f32 -1.442695, %v890_v23  ;;  %v2471_v36 = vmul.f32 -1.442695, %v858_v24 }
 0x95b   :  { %2832 = vtanh.f32 %v858_v24 }
 0x95c   :  { %2834 = vpow2.f32 %v2472_v29  ;;  %v1119_v29 = vld [vmem:[#allocation2 + $0x4] sm:$0x1] }
 0x95d   :  { %2836 = vpow2.f32 %v2473_v31 }
 0x95e   :  { %2838 = vpow2.f32 %v2471_v36 }
 0x962   :  { %v2829_v25 = vpop.eup %2828 }
 0x963   :  { %909 = vrot.lane.b32.xlu0 %v2829_v25, %s3079_s0 }
 0x964   :  { %v2831_v26 = vpop.eup %2830 }
 0x965   :  { %911 = vrot.lane.b32.xlu1 %v2831_v26, %s3079_s0  ;;  %v2833_v28 = vpop.eup %2832 }
 0x966   :  { %v2835_v37 = vpop.eup %2834 }
 0x967   :  { %v897_v43 = vadd.f32 1.0, %v2835_v37  ;;  %v2837_v46 = vpop.eup %2836 }
 0x968   :  { %v898_v47 = vadd.f32 1.0, %v2837_v46  ;;  %v2839_v33 = vpop.eup %2838  ;;  %v1120_v46 = vld [vmem:[#allocation2 + $0xc] sm:$0x1] }
 0x969   :  { %868 = vrot.lane.b32.xlu1 %v2833_v28, %s3079_s0  ;;  %2840 = vrcp.f32 %v897_v43  ;;  %v862_v27 = vadd.f32 1.0, %v2839_v33 }
 0x96a   :  { %2842 = vrcp.f32 %v898_v47 }
 0x96b   :  { %2844 = vrcp.f32 %v862_v27 }
 0x973   :  { %v2841_v38 = vpop.eup %2840 }
 0x974   :  { %v2843_v53 = vpop.eup %2842  ;;  %v905_v61 = vmul.f32 %v2841_v38, %v3304_v32 }
 0x975   :  { %v2845_v58 = vpop.eup %2844  ;;  %v906_v1 = vmul.f32 %v2843_v53, %v3308_v42 }
 0x976   :  { %v866_v4 = vmul.f32 %v2845_v58, %v3312_v30 }
 0x9d5   :  { %v910_v48 = vpop.permute.xlu0 %909 }
 0x9d6   :  { %v915_v52 = vmul.f32 %v2841_v38, %v910_v48 }
 0x9d7   :  { %v912_v54 = vpop.permute.xlu1 %911 }
 0x9d8   :  { %919 = vrot.lane.b32.xlu1 %v915_v52, %s3079_s0  ;;  %v916_v57 = vmul.f32 %v2843_v53, %v912_v54 }
 0x9da   :  { %921 = vrot.lane.b32.xlu0 %v916_v57, %s3079_s0 }
 0x9db   :  { %v869_v59 = vpop.permute.xlu1 %868 }
 0x9dc   :  { %v871_v60 = vmul.f32 %v2845_v58, %v869_v59 }
 0x9de   :  { %873 = vrot.lane.b32.xlu0 %v871_v60, %s3079_s0 }
 0xa4a   :  { %v920_v62 = vpop.permute.xlu1 %919 }
 0xa4b   :  { %v3364_v63 = vadd.f32 %v920_v62, %v905_v61 }
 0xa4c   :  { %v922_v2 = vpop.permute.xlu0 %921 }
 0xa4d   :  { %2846 = vtanh.f32 %v3364_v63  ;;  %v3368_v3 = vadd.f32 %v922_v2, %v906_v1 }
 0xa4f   :  { %2848 = vtanh.f32 %v3368_v3 }
 0xa50   :  { %v874_v5 = vpop.permute.xlu0 %873 }
 0xa51   :  { %v3372_v55 = vadd.f32 %v874_v5, %v866_v4 }
 0xa53   :  { %2850 = vtanh.f32 %v3372_v55 }
 0xa57   :  { %v2847_v7 = vpop.eup %2846 }
 0xa58   :  { %931 = vrot.lane.b32.xlu0 %v2847_v7, %s3079_s0 }
 0xa59   :  { %v2849_v32 = vpop.eup %2848 }
 0xa5a   :  { %933 = vrot.lane.b32.xlu1 %v2849_v32, %s3079_s0 }
 0xa5d   :  { %v2851_v8 = vpop.eup %2850 }
 0xa5e   :  { %879 = vrot.lane.b32.xlu1 %v2851_v8, %s3079_s0 }
 0xaca   :  { %v932_v42 = vpop.permute.xlu0 %931 }
 0xacb   :  { %v937_v13 = vmul.f32 %v2841_v38, %v932_v42 }
 0xacc   :  { %v934_v9 = vpop.permute.xlu1 %933 }
 0xacd   :  { %v938_v12 = vmul.f32 %v2843_v53, %v934_v9 }
 0xacf   :  { %v1016_v14 = vrot.slane %v938_v12, 7 }
 0xad0   :  { %v880_v30 = vpop.permute.xlu1 %879 }
 0xad1   :  { %v882_v15 = vmul.f32 %v2845_v58, %v880_v30  ;;  %v1017_v16 = vsel %vm308_vm3, %v1016_v14, %v937_v13 }
 0xad2   :  { %1018 = vrot.lane.b32.xlu0 %v1017_v16, %s3083_s4 }
 0xad3   :  { %v2137_v17 = vrot.slane %v882_v15, %v3322_v56  ;;  %940 = vrot.lane.b32.xlu1 %v882_v15, %s3083_s4 }
 0xad5   :  { %v2138_v18 = vcombine.high %v2137_v17, %v2137_v17  ;;  %v2145_v19 = vrot.slane %v2137_v17, %v3322_v56 }
 0xad7   :  { %v2152_v20 = vrot.slane %v2138_v18, %v3322_v56  ;;  %v2276_v21 = vrot.slane %v2145_v19, %v3329_v0 }
 0xad9   :  { %v2280_v22 = vrot.slane %v2152_v20, %v3329_v0  ;;  %v3387_v23 = vsel %vm2336_vm6, %v3339_v10, %v2276_v21 }
 0xadb   :  { %v3390_v24 = vsel %vm2336_vm6, %v3341_v11, %v2280_v22 }
 0xb44   :  { %v1019_v25 = vpop.permute.xlu0 %1018 }
 0xb45   :  { %2475 = vmatmul.mubr.msk.f32.vlgmr.msra.gmra.mrb[8].mxu0 %vm231_vm4, %v1019_v25  ;;  %v941_v26 = vpop.permute.xlu1 %940 }
 0xb46   :  { %2589 = vmatmul.mubr.msk.f32.vlgmr.msra.gmra.mrb[6].mxu1 %vm231_vm4, %v941_v26  ;;  %2700 = vmatpush1.bf16.msra.mxu0 %v3210_v41 }
 0xb47   :  { %2693 = vmatpush3.bf16.msra.mxu1 %v3208_v40  ;;  %2702 = vmatprep.subr.bf16.mxu0 %v3217_v45 }
 0xb48   :  { %2694 = vmatprep.subr.bf16.mxu1 %v3080_v34  ;;  %1322 = vmatprep.mubr.f32.mxu0 %v3082_v39 }
 0xb49   :  { %2599 = vmatprep.mubr.msk.f32.mxu1 %vm3081_vm2, %v3082_v39 }
 0xb4a   :  { %2704 = vmatpush1.bf16.msra.mxu0 %v3226_v50 }
 0xb4b   :  { %2696 = vmatpush3.bf16.msra.mxu1 %v3224_v49  ;;  %2712 = vmatprep.subr.bf16.mxu0 %v3201_v35 }
 0xb4c   :  { %2705 = vmatprep.subr.bf16.mxu1 %v3080_v34 }
 0xc18   :  { %v1088_v10 = vpop.f32.mrb[8].mxu0 }
 0xc19   :  { %v1010_v11 = vpop.f32.mrb[6].mxu1  ;;  %v1090_v28 = vpop.f32.mrb[9].mxu0 }
 0xc1a   :  { %v1093_v31 = vadd.f32 %v1088_v10, %v1010_v11  ;;  %v1122_v36 = vrot.slane %v1090_v28, 1  ;;  %v1125_v37 = vadd.f32 %v1119_v29, %v1090_v28  ;;  %v2590_v43 = vpop.f32.mrb[7].mxu1 }
 0xc1c   :  { %2852 = vtanh.f32 %v1125_v37  ;;  %v1126_v47 = vadd.f32 %v1122_v36, %v1120_v46  ;;  %v1094_v33 = vadd.f32 %v3254_v6, %v1093_v31  ;;  %v2477_v52 = vmul.f32 -1.442695, %v1125_v37 }
 0xc1e   :  { %2854 = vtanh.f32 %v1126_v47  ;;  %v2478_v53 = vmul.f32 -1.442695, %v1126_v47  ;;  %v2476_v54 = vmul.f32 -1.442695, %v1094_v33 }
 0xc1f   :  { %2856 = vtanh.f32 %v1094_v33 }
 0xc20   :  { %2858 = vpow2.f32 %v2477_v52  ;;  %v1355_v52 = vld [vmem:[#allocation2 + $0x5] sm:$0x1] }
 0xc21   :  { %2860 = vpow2.f32 %v2478_v53 }
 0xc22   :  { %2862 = vpow2.f32 %v2476_v54 }
 0xc26   :  { %v2853_v27 = vpop.eup %2852 }
 0xc27   :  { %1145 = vrot.lane.b32.xlu1 %v2853_v27, %s3079_s0 }
 0xc28   :  { %v2855_v38 = vpop.eup %2854 }
 0xc29   :  { %1147 = vrot.lane.b32.xlu0 %v2855_v38, %s3079_s0  ;;  %v2857_v48 = vpop.eup %2856 }
 0xc2a   :  { %v2859_v57 = vpop.eup %2858 }
 0xc2b   :  { %v1133_v58 = vadd.f32 1.0, %v2859_v57  ;;  %v2861_v59 = vpop.eup %2860 }
 0xc2c   :  { %v1134_v60 = vadd.f32 1.0, %v2861_v59  ;;  %v2863_v61 = vpop.eup %2862  ;;  %v1356_v59 = vld [vmem:[#allocation2 + $0xd] sm:$0x1] }
 0xc2d   :  { %1104 = vrot.lane.b32.xlu0 %v2857_v48, %s3079_s0  ;;  %2864 = vrcp.f32 %v1133_v58  ;;  %v1098_v62 = vadd.f32 1.0, %v2863_v61 }
 0xc2e   :  { %2866 = vrcp.f32 %v1134_v60 }
 0xc2f   :  { %2868 = vrcp.f32 %v1098_v62 }
 0xc37   :  { %v2865_v1 = vpop.eup %2864 }
 0xc38   :  { %v2867_v5 = vpop.eup %2866  ;;  %v1141_v12 = vmul.f32 %v2865_v1, %v3364_v63 }
 0xc39   :  { %v2869_v8 = vpop.eup %2868  ;;  %v1142_v30 = vmul.f32 %v2867_v5, %v3368_v3 }
 0xc3a   :  { %v1102_v17 = vmul.f32 %v2869_v8, %v3372_v55 }
 0xc99   :  { %v1146_v2 = vpop.permute.xlu1 %1145 }
 0xc9a   :  { %v1151_v4 = vmul.f32 %v2865_v1, %v1146_v2 }
 0xc9b   :  { %v1148_v7 = vpop.permute.xlu0 %1147 }
 0xc9c   :  { %1155 = vrot.lane.b32.xlu0 %v1151_v4, %s3079_s0  ;;  %v1152_v32 = vmul.f32 %v2867_v5, %v1148_v7 }
 0xc9e   :  { %1157 = vrot.lane.b32.xlu1 %v1152_v32, %s3079_s0 }
 0xc9f   :  { %v1105_v42 = vpop.permute.xlu0 %1104 }
 0xca0   :  { %v1107_v9 = vmul.f32 %v2869_v8, %v1105_v42 }
 0xca2   :  { %1109 = vrot.lane.b32.xlu1 %v1107_v9, %s3079_s0 }
 0xd0e   :  { %v1156_v13 = vpop.permute.xlu0 %1155 }
 0xd0f   :  { %v3413_v14 = vadd.f32 %v1156_v13, %v1141_v12 }
 0xd10   :  { %v1158_v15 = vpop.permute.xlu1 %1157 }
 0xd11   :  { %2870 = vtanh.f32 %v3413_v14  ;;  %v3417_v16 = vadd.f32 %v1158_v15, %v1142_v30 }
 0xd13   :  { %2872 = vtanh.f32 %v3417_v16 }
 0xd14   :  { %v1110_v18 = vpop.permute.xlu1 %1109 }
 0xd15   :  { %v3421_v19 = vadd.f32 %v1110_v18, %v1102_v17 }
 0xd17   :  { %2874 = vtanh.f32 %v3421_v19 }
 0xd1b   :  { %v2871_v20 = vpop.eup %2870 }
 0xd1c   :  { %1167 = vrot.lane.b32.xlu1 %v2871_v20, %s3079_s0 }
 0xd1d   :  { %v2873_v63 = vpop.eup %2872 }
 0xd1e   :  { %1169 = vrot.lane.b32.xlu0 %v2873_v63, %s3079_s0 }
 0xd21   :  { %v2875_v21 = vpop.eup %2874 }
 0xd22   :  { %1115 = vrot.lane.b32.xlu0 %v2875_v21, %s3079_s0 }
 0xd8e   :  { %v1168_v3 = vpop.permute.xlu1 %1167 }
 0xd8f   :  { %v1173_v26 = vmul.f32 %v2865_v1, %v1168_v3 }
 0xd90   :  { %v1170_v22 = vpop.permute.xlu0 %1169 }
 0xd91   :  { %v1174_v25 = vmul.f32 %v2867_v5, %v1170_v22 }
 0xd93   :  { %v1252_v10 = vrot.slane %v1174_v25, 7 }
 0xd94   :  { %v1116_v55 = vpop.permute.xlu0 %1115 }
 0xd95   :  { %v1118_v11 = vmul.f32 %v2869_v8, %v1116_v55  ;;  %v1253_v28 = vsel %vm308_vm3, %v1252_v10, %v1173_v26 }
 0xd96   :  { %1254 = vrot.lane.b32.xlu1 %v1253_v28, %s3083_s4 }
 0xd97   :  { %v2159_v29 = vrot.slane %v1118_v11, %v3322_v56  ;;  %1176 = vrot.lane.b32.xlu0 %v1118_v11, %s3083_s4 }
 0xd99   :  { %v2160_v31 = vcombine.high %v2159_v29, %v2159_v29  ;;  %v2167_v36 = vrot.slane %v2159_v29, %v3322_v56 }
 0xd9b   :  { %v2174_v37 = vrot.slane %v2160_v31, %v3322_v56  ;;  %v2286_v43 = vrot.slane %v2167_v36, %v3329_v0 }
 0xd9d   :  { %v2290_v46 = vrot.slane %v2174_v37, %v3329_v0  ;;  %v3436_v47 = vsel %vm2339_vm7, %v3387_v23, %v2286_v43 }
 0xd9f   :  { %v3439_v33 = vsel %vm2339_vm7, %v3390_v24, %v2290_v46 }
 0xe08   :  { %v1255_v27 = vpop.permute.xlu1 %1254 }
 0xe09   :  { %v1177_v38 = vpop.permute.xlu0 %1176  ;;  %2480 = vmatmul.mubr.msk.f32.vlgmr.msra.gmra.mrb[10].mxu0 %vm231_vm4, %v1255_v27 }
 0xe0a   :  { %2600 = vmatmul.mubr.msk.f32.vlgmr.msra.gmra.mrb[8].mxu1 %vm231_vm4, %v1177_v38  ;;  %2714 = vmatpush1.bf16.msra.mxu0 %v3210_v41 }
 0xe0b   :  { %2707 = vmatpush3.bf16.msra.mxu1 %v3208_v40  ;;  %2716 = vmatprep.subr.bf16.mxu0 %v3217_v45 }
 0xe0c   :  { %2708 = vmatprep.subr.bf16.mxu1 %v3080_v34  ;;  %1558 = vmatprep.mubr.f32.mxu0 %v3082_v39 }
 0xe0d   :  { %2610 = vmatprep.mubr.msk.f32.mxu1 %vm3081_vm2, %v3082_v39 }
 0xe0e   :  { %2718 = vmatpush1.bf16.msra.mxu0 %v3226_v50 }
 0xe0f   :  { %2710 = vmatpush3.bf16.msra.mxu1 %v3224_v49  ;;  %2726 = vmatprep.subr.bf16.mxu0 %v3201_v35 }
 0xe10   :  { %2719 = vmatprep.subr.bf16.mxu1 %v3080_v34 }
 0xedc   :  { %v1324_v23 = vpop.f32.mrb[10].mxu0 }
 0xedd   :  { %v1246_v24 = vpop.f32.mrb[8].mxu1  ;;  %v1326_v48 = vpop.f32.mrb[11].mxu0 }
 0xede   :  { %v1329_v53 = vadd.f32 %v1324_v23, %v1246_v24  ;;  %v1358_v54 = vrot.slane %v1326_v48, 1  ;;  %v1361_v57 = vadd.f32 %v1355_v52, %v1326_v48  ;;  %v2601_v58 = vpop.f32.mrb[9].mxu1 }
 0xee0   :  { %2876 = vtanh.f32 %v1361_v57  ;;  %v1362_v60 = vadd.f32 %v1358_v54, %v1356_v59  ;;  %v1330_v61 = vadd.f32 %v3254_v6, %v1329_v53  ;;  %v2482_v4 = vmul.f32 -1.442695, %v1361_v57 }
 0xee2   :  { %2878 = vtanh.f32 %v1362_v60  ;;  %v2483_v5 = vmul.f32 -1.442695, %v1362_v60  ;;  %v2481_v7 = vmul.f32 -1.442695, %v1330_v61 }
 0xee3   :  { %2880 = vtanh.f32 %v1330_v61 }
 0xee4   :  { %2882 = vpow2.f32 %v2482_v4  ;;  %v1591_v4 = vld [vmem:[#allocation2 + $0x6] sm:$0x1] }
 0xee5   :  { %2884 = vpow2.f32 %v2483_v5 }
 0xee6   :  { %2886 = vpow2.f32 %v2481_v7 }
 0xeea   :  { %v2877_v62 = vpop.eup %2876 }
 0xeeb   :  { %1381 = vrot.lane.b32.xlu0 %v2877_v62, %s3079_s0 }
 0xeec   :  { %v2879_v1 = vpop.eup %2878 }
 0xeed   :  { %1383 = vrot.lane.b32.xlu1 %v2879_v1, %s3079_s0  ;;  %v2881_v2 = vpop.eup %2880 }
 0xeee   :  { %v2883_v32 = vpop.eup %2882 }
 0xeef   :  { %v1369_v8 = vadd.f32 1.0, %v2883_v32  ;;  %v2885_v42 = vpop.eup %2884 }
 0xef0   :  { %v1370_v9 = vadd.f32 1.0, %v2885_v42  ;;  %v2887_v12 = vpop.eup %2886  ;;  %v1592_v42 = vld [vmem:[#allocation2 + $0xe] sm:$0x1] }
 0xef1   :  { %1340 = vrot.lane.b32.xlu1 %v2881_v2, %s3079_s0  ;;  %2888 = vrcp.f32 %v1369_v8  ;;  %v1334_v13 = vadd.f32 1.0, %v2887_v12 }
 0xef2   :  { %2890 = vrcp.f32 %v1370_v9 }
 0xef3   :  { %2892 = vrcp.f32 %v1334_v13 }
 0xefb   :  { %v2889_v30 = vpop.eup %2888 }
 0xefc   :  { %v2891_v18 = vpop.eup %2890  ;;  %v1377_v25 = vmul.f32 %v2889_v30, %v3413_v14 }
 0xefd   :  { %v2893_v21 = vpop.eup %2892  ;;  %v1378_v55 = vmul.f32 %v2891_v18, %v3417_v16 }
 0xefe   :  { %v1338_v29 = vmul.f32 %v2893_v21, %v3421_v19 }
 0xf5d   :  { %v1382_v15 = vpop.permute.xlu0 %1381 }
 0xf5e   :  { %v1387_v17 = vmul.f32 %v2889_v30, %v1382_v15 }
 0xf5f   :  { %v1384_v20 = vpop.permute.xlu1 %1383 }
 0xf60   :  { %1391 = vrot.lane.b32.xlu1 %v1387_v17, %s3079_s0  ;;  %v1388_v63 = vmul.f32 %v2891_v18, %v1384_v20 }
 0xf62   :  { %1393 = vrot.lane.b32.xlu0 %v1388_v63, %s3079_s0 }
 0xf63   :  { %v1341_v3 = vpop.permute.xlu1 %1340 }
 0xf64   :  { %v1343_v22 = vmul.f32 %v2893_v21, %v1341_v3 }
 0xf66   :  { %1345 = vrot.lane.b32.xlu0 %v1343_v22, %s3079_s0 }
 0xfd2   :  { %v1392_v26 = vpop.permute.xlu1 %1391 }
 0xfd3   :  { %v3462_v10 = vadd.f32 %v1392_v26, %v1377_v25 }
 0xfd4   :  { %v1394_v11 = vpop.permute.xlu0 %1393 }
 0xfd5   :  { %2894 = vtanh.f32 %v3462_v10  ;;  %v3466_v28 = vadd.f32 %v1394_v11, %v1378_v55 }
 0xfd7   :  { %2896 = vtanh.f32 %v3466_v28 }
 0xfd8   :  { %v1346_v31 = vpop.permute.xlu0 %1345 }
 0xfd9   :  { %v3470_v36 = vadd.f32 %v1346_v31, %v1338_v29 }
 0xfdb   :  { %2898 = vtanh.f32 %v3470_v36 }
 0xfdf   :  { %v2895_v37 = vpop.eup %2894 }
 0xfe0   :  { %1403 = vrot.lane.b32.xlu0 %v2895_v37, %s3079_s0 }
 0xfe1   :  { %v2897_v14 = vpop.eup %2896 }
 0xfe2   :  { %1405 = vrot.lane.b32.xlu1 %v2897_v14, %s3079_s0 }
 0xfe5   :  { %v2899_v43 = vpop.eup %2898 }
 0xfe6   :  { %1351 = vrot.lane.b32.xlu1 %v2899_v43, %s3079_s0 }
0x1052   :  { %v1404_v16 = vpop.permute.xlu0 %1403 }
0x1053   :  { %v1409_v38 = vmul.f32 %v2889_v30, %v1404_v16 }
0x1054   :  { %v1406_v46 = vpop.permute.xlu1 %1405 }
0x1055   :  { %v1410_v27 = vmul.f32 %v2891_v18, %v1406_v46 }
0x1057   :  { %v1488_v23 = vrot.slane %v1410_v27, 7 }
0x1058   :  { %v1352_v19 = vpop.permute.xlu1 %1351 }
0x1059   :  { %v1354_v24 = vmul.f32 %v2893_v21, %v1352_v19  ;;  %v1489_v48 = vsel %vm308_vm3, %v1488_v23, %v1409_v38 }
0x105a   :  { %1490 = vrot.lane.b32.xlu0 %v1489_v48, %s3083_s4 }
0x105b   :  { %v2181_v52 = vrot.slane %v1354_v24, %v3322_v56  ;;  %1412 = vrot.lane.b32.xlu1 %v1354_v24, %s3083_s4 }
0x105d   :  { %v2182_v53 = vcombine.high %v2181_v52, %v2181_v52  ;;  %v2189_v54 = vrot.slane %v2181_v52, %v3322_v56 }
0x105f   :  { %v2196_v57 = vrot.slane %v2182_v53, %v3322_v56  ;;  %v2296_v58 = vrot.slane %v2189_v54, %v3329_v0 }
0x1061   :  { %v2300_v59 = vrot.slane %v2196_v57, %v3329_v0  ;;  %v3486_v60 = vsel %vm79_vm0, %v3436_v47, %v2296_v58 }
0x1063   :  { %v3490_v61 = vsel %vm79_vm0, %v3439_v33, %v2300_v59 }
0x10cc   :  { %v1491_v62 = vpop.permute.xlu0 %1490 }
0x10cd   :  { %2485 = vmatmul.mubr.msk.f32.vlgmr.msra.gmra.mrb[12].mxu0 %vm231_vm4, %v1491_v62  ;;  %v1413_v1 = vpop.permute.xlu1 %1412 }
0x10ce   :  { %2611 = vmatmul.mubr.msk.f32.vlgmr.msra.gmra.mrb[10].mxu1 %vm231_vm4, %v1413_v1  ;;  %2728 = vmatpush1.bf16.msra.mxu0 %v3210_v41 }
0x10cf   :  { %2721 = vmatpush3.bf16.msra.mxu1 %v3208_v40  ;;  %2730 = vmatprep.subr.bf16.mxu0 %v3217_v45 }
0x10d0   :  { %2722 = vmatprep.subr.bf16.mxu1 %v3080_v34  ;;  %1794 = vmatprep.mubr.f32.mxu0 %v3082_v39 }
0x10d1   :  { %2621 = vmatprep.mubr.msk.f32.mxu1 %vm3081_vm2, %v3082_v39 }
0x10d2   :  { %2732 = vmatpush1.bf16.msra.mxu0 %v3226_v50 }
0x10d3   :  { %2724 = vmatpush3.bf16.msra.mxu1 %v3224_v49  ;;  %2740 = vmatprep.subr.bf16.mxu0 %v3201_v35 }
0x10d4   :  { %2733 = vmatprep.subr.bf16.mxu1 %v3080_v34 }
0x11a0   :  { %v1560_v47 = vpop.f32.mrb[12].mxu0 }
0x11a1   :  { %v1482_v33 = vpop.f32.mrb[10].mxu1  ;;  %v1562_v2 = vpop.f32.mrb[13].mxu0 }
0x11a2   :  { %v1565_v5 = vadd.f32 %v1560_v47, %v1482_v33  ;;  %v1594_v7 = vrot.slane %v1562_v2, 1  ;;  %v1597_v32 = vadd.f32 %v1591_v4, %v1562_v2  ;;  %v2612_v8 = vpop.f32.mrb[11].mxu1 }
0x11a4   :  { %2900 = vtanh.f32 %v1597_v32  ;;  %v1598_v9 = vadd.f32 %v1594_v7, %v1592_v42  ;;  %v1566_v12 = vadd.f32 %v3254_v6, %v1565_v5  ;;  %v2487_v15 = vmul.f32 -1.442695, %v1597_v32 }
0x11a6   :  { %2902 = vtanh.f32 %v1598_v9  ;;  %v2488_v17 = vmul.f32 -1.442695, %v1598_v9  ;;  %v2486_v18 = vmul.f32 -1.442695, %v1566_v12 }
0x11a7   :  { %2904 = vtanh.f32 %v1566_v12 }
0x11a8   :  { %2906 = vpow2.f32 %v2487_v15 }
0x11a9   :  { %2908 = vpow2.f32 %v2488_v17  ;;  %v3555_v17 = vld [vmem:[%s3653_s5] ss:$0 sm:$0xff]  ;;  %s3086_s5 = smov 96  }
0x11aa   :  { %2910 = vpow2.f32 %v2486_v18 }
0x11ae   :  { %v2901_v13 = vpop.eup %2900 }
0x11af   :  { %1617 = vrot.lane.b32.xlu1 %v2901_v13, %s3079_s0 }
0x11b0   :  { %v2903_v35 = vpop.eup %2902 }
0x11b1   :  { %1619 = vrot.lane.b32.xlu0 %v2903_v35, %s3079_s0  ;;  %v2905_v30 = vpop.eup %2904  ;;  %v1827_v35 = vld [vmem:[#allocation2 + $0x7] sm:$0x1] }
0x11b2   :  { %v2907_v20 = vpop.eup %2906 }
0x11b3   :  { %v1605_v63 = vadd.f32 1.0, %v2907_v20  ;;  %v2909_v6 = vpop.eup %2908 }
0x11b4   :  { %v1606_v21 = vadd.f32 1.0, %v2909_v6  ;;  %v2911_v3 = vpop.eup %2910 }
0x11b5   :  { %1576 = vrot.lane.b32.xlu0 %v2905_v30, %s3079_s0  ;;  %2912 = vrcp.f32 %v1605_v63  ;;  %v1570_v22 = vadd.f32 1.0, %v2911_v3 }
0x11b6   :  { %2914 = vrcp.f32 %v1606_v21 }
0x11b7   :  { %2916 = vrcp.f32 %v1570_v22 }
0x11bf   :  { %v2913_v25 = vpop.eup %2912 }
0x11c0   :  { %v2915_v11 = vpop.eup %2914  ;;  %v1613_v16 = vmul.f32 %v2913_v25, %v3462_v10 }
0x11c1   :  { %v2917_v37 = vpop.eup %2916  ;;  %v1614_v38 = vmul.f32 %v2915_v11, %v3466_v28 }
0x11c2   :  { %v1574_v24 = vmul.f32 %v2917_v37, %v3470_v36 }
0x1221   :  { %v1618_v26 = vpop.permute.xlu1 %1617 }
0x1222   :  { %v1623_v55 = vmul.f32 %v2913_v25, %v1618_v26 }
0x1223   :  { %v1620_v29 = vpop.permute.xlu0 %1619 }
0x1224   :  { %1627 = vrot.lane.b32.xlu0 %v1623_v55, %s3079_s0  ;;  %v1624_v31 = vmul.f32 %v2915_v11, %v1620_v29 }
0x1226   :  { %1629 = vrot.lane.b32.xlu1 %v1624_v31, %s3079_s0 }
0x1227   :  { %v1577_v14 = vpop.permute.xlu0 %1576 }
0x1228   :  { %v1579_v43 = vmul.f32 %v2917_v37, %v1577_v14 }
0x122a   :  { %1581 = vrot.lane.b32.xlu1 %v1579_v43, %s3079_s0 }
0x1296   :  { %v1628_v46 = vpop.permute.xlu0 %1627 }
0x1297   :  { %v3513_v27 = vadd.f32 %v1628_v46, %v1613_v16 }
0x1298   :  { %v1630_v23 = vpop.permute.xlu1 %1629 }
0x1299   :  { %2918 = vtanh.f32 %v3513_v27  ;;  %v3517_v19 = vadd.f32 %v1630_v23, %v1614_v38 }
0x129b   :  { %2920 = vtanh.f32 %v3517_v19 }
0x129c   :  { %v1582_v48 = vpop.permute.xlu1 %1581 }
0x129d   :  { %v3521_v52 = vadd.f32 %v1582_v48, %v1574_v24 }
0x129f   :  { %2922 = vtanh.f32 %v3521_v52 }
0x12a3   :  { %v2919_v53 = vpop.eup %2918 }
0x12a4   :  { %1639 = vrot.lane.b32.xlu1 %v2919_v53, %s3079_s0 }
0x12a5   :  { %v2921_v10 = vpop.eup %2920 }
0x12a6   :  { %1641 = vrot.lane.b32.xlu0 %v2921_v10, %s3079_s0 }
0x12a9   :  { %v2923_v54 = vpop.eup %2922 }
0x12aa   :  { %1587 = vrot.lane.b32.xlu0 %v2923_v54, %s3079_s0 }
0x1316   :  { %v1640_v28 = vpop.permute.xlu1 %1639 }
0x1317   :  { %v1645_v59 = vmul.f32 %v2913_v25, %v1640_v28 }
0x1318   :  { %v1642_v57 = vpop.permute.xlu0 %1641 }
0x1319   :  { %v1646_v58 = vmul.f32 %v2915_v11, %v1642_v57 }
0x131b   :  { %v1724_v62 = vrot.slane %v1646_v58, 7 }
0x131c   :  { %v1588_v36 = vpop.permute.xlu0 %1587 }
0x131d   :  { %v1590_v1 = vmul.f32 %v2917_v37, %v1588_v36  ;;  %v1725_v47 = vsel %vm308_vm3, %v1724_v62, %v1645_v59 }
0x131e   :  { %1726 = vrot.lane.b32.xlu1 %v1725_v47, %s3083_s4 }
0x131f   :  { %v2203_v33 = vrot.slane %v1590_v1, %v3322_v56  ;;  %1648 = vrot.lane.b32.xlu0 %v1590_v1, %s3083_s4 }
0x1321   :  { %v2204_v2 = vcombine.high %v2203_v33, %v2203_v33  ;;  %v2211_v4 = vrot.slane %v2203_v33, %v3322_v56 }
0x1323   :  { %v2218_v5 = vrot.slane %v2204_v2, %v3322_v56  ;;  %v2306_v7 = vrot.slane %v2211_v4, %v3329_v0 }
0x1325   :  { %v2310_v32 = vrot.slane %v2218_v5, %v3329_v0  ;;  %v3536_v8 = vsel %vm2344_vm8, %v3486_v60, %v2306_v7 }
0x1327   :  { %v3539_v42 = vsel %vm2344_vm8, %v3490_v61, %v2310_v32 }
0x1390   :  { %v1727_v9 = vpop.permute.xlu1 %1726 }
0x1391   :  { %v1649_v12 = vpop.permute.xlu0 %1648  ;;  %2490 = vmatmul.mubr.msk.f32.vlgmr.msra.gmra.mrb[14].mxu0 %vm231_vm4, %v1727_v9 }
0x1392   :  { %2622 = vmatmul.mubr.msk.f32.vlgmr.msra.gmra.mrb[12].mxu1 %vm231_vm4, %v1649_v12  ;;  %2742 = vmatpush1.bf16.msra.mxu0 %v3210_v41 }
0x1393   :  { %2735 = vmatpush3.bf16.msra.mxu1 %v3208_v40  ;;  %2744 = vmatprep.subr.bf16.mxu0 %v3217_v45  ;;  %v1828_v45 = vld [vmem:[#allocation2 + $0xf] sm:$0x1] }
0x1394   :  { %2736 = vmatprep.subr.bf16.mxu1 %v3080_v34  ;;  %2030 = vmatprep.mubr.f32.mxu0 %v3082_v39 }
0x1395   :  { %2632 = vmatprep.mubr.msk.f32.mxu1 %vm3081_vm2, %v3082_v39 }
0x1396   :  { %2746 = vmatpush1.bf16.msra.mxu0 %v3226_v50 }
0x1397   :  { %2738 = vmatpush3.bf16.msra.mxu1 %v3224_v49 }
0x1464   :  { %v1796_v60 = vpop.f32.mrb[14].mxu0 }
0x1465   :  { %v1718_v61 = vpop.f32.mrb[12].mxu1  ;;  %v1798_v13 = vpop.f32.mrb[15].mxu0 }
0x1466   :  { %v1801_v41 = vadd.f32 %v1796_v60, %v1718_v61  ;;  %v1830_v30 = vrot.slane %v1798_v13, 1  ;;  %v1833_v40 = vadd.f32 %v1827_v35, %v1798_v13  ;;  %v2623_v15 = vpop.f32.mrb[13].mxu1 }
0x1468   :  { %2924 = vtanh.f32 %v1833_v40  ;;  %v1834_v34 = vadd.f32 %v1830_v30, %v1828_v45  ;;  %v1802_v39 = vadd.f32 %v3555_v17, %v1801_v41  ;;  %v2492_v20 = vmul.f32 -1.442695, %v1833_v40 }
0x146a   :  { %2926 = vtanh.f32 %v1834_v34  ;;  %v2493_v63 = vmul.f32 -1.442695, %v1834_v34  ;;  %v2491_v6 = vmul.f32 -1.442695, %v1802_v39 }
0x146b   :  { %2928 = vtanh.f32 %v1802_v39 }
0x146c   :  { %2930 = vpow2.f32 %v2492_v20 }
0x146d   :  { %2932 = vpow2.f32 %v2493_v63 }
0x146e   :  { %2934 = vpow2.f32 %v2491_v6 }
0x1472   :  { %v2925_v49 = vpop.eup %2924 }
0x1473   :  { %1853 = vrot.lane.b32.xlu0 %v2925_v49, %s3079_s0 }
0x1474   :  { %v2927_v50 = vpop.eup %2926 }
0x1475   :  { %1855 = vrot.lane.b32.xlu1 %v2927_v50, %s3079_s0  ;;  %v2929_v18 = vpop.eup %2928 }
0x1476   :  { %v2931_v21 = vpop.eup %2930 }
0x1477   :  { %v1841_v3 = vadd.f32 1.0, %v2931_v21  ;;  %v2933_v22 = vpop.eup %2932 }
0x1478   :  { %v1842_v25 = vadd.f32 1.0, %v2933_v22  ;;  %v2935_v26 = vpop.eup %2934 }
0x1479   :  { %1812 = vrot.lane.b32.xlu1 %v2929_v18, %s3079_s0  ;;  %2936 = vrcp.f32 %v1841_v3  ;;  %v1806_v55 = vadd.f32 1.0, %v2935_v26  ;;  %v2497_v3 = vld [vmem:[#allocation7] ss:$0 sm:$0xff] }
0x147a   :  { %2938 = vrcp.f32 %v1842_v25 }
0x147b   :  { %2940 = vrcp.f32 %v1806_v55 }
0x1483   :  { %v2937_v11 = vpop.eup %2936 }
0x1484   :  { %v2939_v37 = vpop.eup %2938  ;;  %v1849_v23 = vmul.f32 %v2937_v11, %v3513_v27 }
0x1485   :  { %v2941_v16 = vpop.eup %2940  ;;  %v1850_v53 = vmul.f32 %v2939_v37, %v3517_v19 }
0x1486   :  { %v1810_v57 = vmul.f32 %v2941_v16, %v3521_v52 }
0x14e5   :  { %v1854_v29 = vpop.permute.xlu0 %1853 }
0x14e6   :  { %v1859_v31 = vmul.f32 %v2937_v11, %v1854_v29 }
0x14e7   :  { %v1856_v14 = vpop.permute.xlu1 %1855 }
0x14e8   :  { %1863 = vrot.lane.b32.xlu1 %v1859_v31, %s3079_s0  ;;  %v1860_v43 = vmul.f32 %v2939_v37, %v1856_v14 }
0x14ea   :  { %1865 = vrot.lane.b32.xlu0 %v1860_v43, %s3079_s0 }
0x14eb   :  { %v1813_v46 = vpop.permute.xlu1 %1812 }
0x14ec   :  { %v1815_v38 = vmul.f32 %v2941_v16, %v1813_v46 }
0x14ee   :  { %1817 = vrot.lane.b32.xlu0 %v1815_v38, %s3079_s0 }
0x155a   :  { %v1864_v24 = vpop.permute.xlu1 %1863 }
0x155b   :  { %v1869_v48 = vadd.f32 %v1864_v24, %v1849_v23 }
0x155c   :  { %v1866_v10 = vpop.permute.xlu0 %1865 }
0x155d   :  { %2942 = vtanh.f32 %v1869_v48  ;;  %v1870_v54 = vadd.f32 %v1866_v10, %v1850_v53  ;;  %v3085_v53 = vmov 0  }
0x155e   :  { %2763 = vset.pattern.permute.xlu0 %v3085_v53 }
0x155f   :  { %2944 = vtanh.f32 %v1870_v54  ;;  %v2073_v28 = vrot.slane %v1870_v54, 7 }
0x1560   :  { %v1818_v58 = vpop.permute.xlu0 %1817 }
0x1561   :  { %v1820_v59 = vadd.f32 %v1818_v58, %v1810_v57  ;;  %v3568_v62 = vsel %vm308_vm3, %v2073_v28, %v1869_v48  ;;  %v2498_v58 = vld [vmem:[#allocation3] ss:$0 sm:$0xff] }
0x1563   :  { %2946 = vtanh.f32 %v1820_v59 }
0x1567   :  { %v2943_v36 = vpop.eup %2942 }
0x1568   :  { %1875 = vrot.lane.b32.xlu0 %v2943_v36, %s3079_s0 }
0x1569   :  { %v2945_v27 = vpop.eup %2944 }
0x156a   :  { %1877 = vrot.lane.b32.xlu1 %v2945_v27, %s3079_s0 }
0x156d   :  { %v2947_v1 = vpop.eup %2946 }
0x156e   :  { %1823 = vrot.lane.b32.xlu1 %v2947_v1, %s3079_s0 }
0x15da   :  { %v1876_v19 = vpop.permute.xlu0 %1875 }
0x15db   :  { %v1881_v2 = vmul.f32 %v2937_v11, %v1876_v19 }
0x15dc   :  { %v1878_v47 = vpop.permute.xlu1 %1877 }
0x15dd   :  { %v1882_v33 = vmul.f32 %v2939_v37, %v1878_v47 }
0x15df   :  { %v1960_v52 = vrot.slane %v1882_v33, 7 }
0x15e0   :  { %v1824_v4 = vpop.permute.xlu1 %1823 }
0x15e1   :  { %v1826_v5 = vmul.f32 %v2941_v16, %v1824_v4  ;;  %v1961_v7 = vsel %vm308_vm3, %v1960_v52, %v1881_v2 }
0x15e2   :  { %1962 = vrot.lane.b32.xlu1 %v1961_v7, %s3083_s4 }
0x15e3   :  { %v2225_v32 = vrot.slane %v1826_v5, %v3322_v56  ;;  %1884 = vrot.lane.b32.xlu0 %v1826_v5, %s3083_s4 }
0x15e5   :  { %v2226_v9 = vcombine.high %v2225_v32, %v2225_v32  ;;  %v2233_v12 = vrot.slane %v2225_v32, %v3322_v56 }
0x15e7   :  { %v2240_v60 = vrot.slane %v2226_v9, %v3322_v56  ;;  %v2316_v61 = vrot.slane %v2233_v12, %v3329_v0 }
0x15e9   :  { %v2320_v13 = vrot.slane %v2240_v60, %v3329_v0  ;;  %v2348_v35 = vsel %vm2347_vm9, %v3536_v8, %v2316_v61 }
0x15eb   :  { %v2349_v41 = vsel %vm2347_vm9, %v3539_v42, %v2320_v13 }
0x1654   :  { %v1963_v30 = vpop.permute.xlu1 %1962 }
0x1655   :  { %2064 = vst.msk [vmem:[#allocation10] sm:$0x3] %vm2063_vm10, %v1963_v30  ;;  %v1885_v40 = vpop.permute.xlu0 %1884  ;;  %2495 = vmatmul.mubr.msk.f32.vlgmr.msra.gmra.mrb[16].mxu0 %vm231_vm4, %v1963_v30 }
0x1656   :  { %2633 = vmatmul.mubr.msk.f32.vlgmr.msra.gmra.mrb[14].mxu1 %vm231_vm4, %v1885_v40 }
0x1728   :  { %v2032_v15 = vpop.f32.mrb[16].mxu0 }
0x1729   :  { %v1954_v45 = vpop.f32.mrb[14].mxu1  ;;  %v2034_v34 = vpop.f32.mrb[17].mxu0 }
0x172a   :  { %v2036_v39 = vadd.f32 %v2032_v15, %v1954_v45  ;;  %v2634_v49 = vpop.f32.mrb[15].mxu1 }
0x172c   :  { %v2037_v50 = vadd.f32 %v3555_v17, %v2036_v39 }
0x172e   :  { %2948 = vtanh.f32 %v2037_v50  ;;  %v2496_v42 = vmul.f32 -1.442695, %v2037_v50 }
0x1730   :  { %2950 = vpow2.f32 %v2496_v42 }
0x1738   :  { %v2949_v8 = vpop.eup %2948 }
0x1739   :  { %2047 = vrot.lane.b32.xlu0 %v2949_v8, %s3079_s0 }
0x173a   :  { %v2951_v18 = vpop.eup %2950 }
0x173b   :  { %v2041_v20 = vadd.f32 1.0, %v2951_v18 }
0x173d   :  { %2952 = vrcp.f32 %v2041_v20 }
0x1747   :  { %v2953_v63 = vpop.eup %2952 }
0x1748   :  { %v2045_v22 = vmul.f32 %v2953_v63, %v1820_v59 }
0x17ab   :  { %v2048_v6 = vpop.permute.xlu0 %2047 }
0x17ac   :  { %v2050_v21 = vmul.f32 %v2953_v63, %v2048_v6 }
0x17ae   :  { %2052 = vrot.lane.b32.xlu1 %v2050_v21, %s3079_s0 }
0x17b2   :  { %2359 = vrot.lane.b32.xlu1 %v2497_v3, %s3083_s4 }
0x1820   :  { %v2053_v25 = vpop.permute.xlu1 %2052 }
0x1821   :  { %v2055_v17 = vadd.f32 %v2053_v25, %v2045_v22 }
0x1823   :  { %2954 = vtanh.f32 %v2055_v17 }
0x1824   :  { %v2360_v16 = vpop.permute.xlu1 %2359 }
0x182d   :  { %v2955_v26 = vpop.eup %2954 }
0x182e   :  { %2058 = vrot.lane.b32.xlu0 %v2955_v26, %s3079_s0 }
0x18a0   :  { %v2059_v55 = vpop.permute.xlu0 %2058 }
0x18a1   :  { %v2061_v11 = vmul.f32 %v2953_v63, %v2059_v55 }
0x18a3   :  { %v2247_v29 = vrot.slane %v2061_v11, %v3322_v56 }
0x18a5   :  { %v2248_v31 = vcombine.high %v2247_v29, %v2247_v29  ;;  %v2255_v37 = vrot.slane %v2247_v29, %v3322_v56 }
0x18a7   :  { %v2262_v14 = vrot.slane %v2248_v31, %v3322_v56  ;;  %v2326_v43 = vrot.slane %v2255_v37, %v3329_v0 }
0x18a9   :  { %v2330_v46 = vrot.slane %v2262_v14, %v3329_v0  ;;  %v2351_v38 = vsel %vm2350_vm11, %v2348_v35, %v2326_v43 }
0x18aa   :  { %v2362_v23 = vmul.f32 %v2360_v16, %v2351_v38 }
0x18ab   :  { %v2352_v24 = vsel %vm2350_vm11, %v2349_v41, %v2330_v46 }
0x18ac   :  { %v2363_v48 = vmul.f32 %v2360_v16, %v2352_v24  ;;  %2366 = vrot.lane.b32.xlu0 %v2362_v23, %s3083_s4 }
0x18ae   :  { %2368 = vrot.lane.b32.xlu1 %v2363_v48, %s3083_s4 }
0x18b2   :  { %2066 = vrot.lane.b32.xlu1 %v2061_v11, %s3083_s4 }
0x18b6   :  { %2075 = vrot.lane.b32.xlu1 %v3568_v62, %s3086_s5 }
0x191e   :  { %v2367_v56 = vpop.permute.xlu0 %2366 }
0x191f   :  { %v2372_v10 = vsel %vm231_vm4, %v2367_v56, 0.0 }
0x1920   :  { %2373 = vadd.xlane.f32.xlu0 %v2372_v10  ;;  %v2369_v0 = vpop.permute.xlu1 %2368 }
0x1921   :  { %v2375_v54 = vsel %vm231_vm4, %v2369_v0, 0.0 }
0x1922   :  { %2376 = vadd.xlane.f32.xlu1 %v2375_v54 }
0x1924   :  { %v2067_v28 = vpop.permute.xlu1 %2066 }
0x1925   :  { %2070 = vst.msk [vmem:[#allocation10 + $0x2] sm:$0x3] %vm2063_vm10, %v2067_v28 }
0x1928   :  { %v2076_v57 = vpop.permute.xlu1 %2075 }
0x1929   :  { %2078 = vst.msk [vmem:[#allocation12] sm:$0x3] %vm2063_vm10, %v2076_v57 }
0x1933   :  { %2080 = vrot.lane.b32.xlu1 %v2055_v17, %s3086_s5 }
0x1936   :  { %2385 = vperm.xlu0 %2763, %v2498_v58  }
0x1937   :  { %3012 = shalt.err (!%p3009_p6)
}
0x1938   :  { %s3013_s20 = scalar_lea.hbm %s3657_s9, 64 }
0x1939   :  { %p3014_p7 = scmp.ne.s32.totalorder %s3657_s9, %s3013_s20  ;;  %p3017_p8 = scmp.lt.u32.totalorder %s3013_s20, %s3657_s9 }
0x193b   :  { %p3019_p9 = pnand %p3017_p8, %p3014_p7 }
0x193d   :  { %3022 = shalt.err (!%p3019_p9)
}
0x193e   :  { %s3088_s24 = smov 2   ;;  %s3089_s1 = smov [#allocation12]   ;;  %v2393_v62 = vand.u32 127, %v2088_v51 }
0x193f   :  { %2427 = dma.vmem_to_hbm [thread:$0]  %s2422_s18, 64, %s3657_s9, [#allocation11], %s3079_s0, %s3079_s0, %s3088_s24  }
0x1940   :  { %s2433_s2 = sshll.u32 %s3089_s1, 4  ;;  %v2396_v1 = vsub.s32 %v2393_v62, %v3319_v44  ;;  %s2434_s2 = int_to_ptr.vmem [resolvable:$true] %s2433_s2 }
0x1941   :  { %s3023_s26 = scalar_lea.vmem %s2434_s2, 64  ;;  %p3028_p11 = scmp.lt.s32.totalorder %s2434_s2, %s2434_s2 }
0x1942   :  { %p3024_p10 = scmp.ne.s32.totalorder %s2434_s2, %s3023_s26  ;;  %p3029_p12 = scmp.lt.s32.totalorder %s3023_s26, %s3023_s26 }
0x1944   :  { %p3030_p13 = por %p3029_p12, %p3028_p11 }
0x1946   :  { %p3031_p0 = pnand %p3030_p13, %p3024_p10 }
0x19ad   :  { %v2374_v36 = vpop.xlane.xlu0 %2373 }
0x19af   :  { %v2377_v59 = vpop.xlane.xlu1 %2376 }
0x19b3   :  { %v2081_v27 = vpop.permute.xlu1 %2080 }
0x19b4   :  { %2084 = vst.msk [vmem:[#allocation12 + $0x2] sm:$0x3] %vm2063_vm10, %v2081_v27 }
0x19b5   :  { %v2386_v19 = vpop.permute.xlu0 %2385 }
0x19b6   :  { %3034 = shalt.err (!%p3031_p0)
}
0x19b7   :  { %s3035_s28 = scalar_lea.hbm %s3658_s10, 64 }
0x19b8   :  { %p3036_p1 = scmp.ne.s32.totalorder %s3658_s10, %s3035_s28  ;;  %p3039_p2 = scmp.lt.u32.totalorder %s3035_s28, %s3658_s10 }
0x19ba   :  { %p3041_p3 = pnand %p3039_p2, %p3036_p1 }
0x19bc   :  { %3044 = shalt.err (!%p3041_p3)
}
0x19bd   :  { %2439 = dma.vmem_to_hbm [thread:$0]  %s2434_s2, 64, %s3658_s10, [#allocation11], %s3079_s0, %s3079_s0, %s3088_s24   ;;  %v2388_v51 = vadd.f32 %v2386_v19, %v2374_v36  ;;  %v2389_v44 = vadd.f32 %v2386_v19, %v2377_v59  ;;  %vm2404_vm12 = vcmask 58368  }
0x19be   :  { %s3090_s14 = smov [#allocation9]  }
0x19bf   :  { %s2412_s15 = sshll.u32 %s3090_s14, 4  ;;  %v2397_v47 = vrot.slane %v2388_v51, %v2396_v1  ;;  %v2401_v33 = vrot.slane %v2389_v44, %v2396_v1  ;;  %s2413_s15 = int_to_ptr.vmem [resolvable:$true] %s2412_s15 }
0x19c0   :  { %s3045_s5 = scalar_lea.vmem %s2413_s15, 32  ;;  %p3050_p5 = scmp.lt.s32.totalorder %s2413_s15, %s2413_s15 }
0x19c1   :  { %v2402_v2 = vsel %vm308_vm3, %v2401_v33, %v2397_v47  ;;  %p3046_p4 = scmp.ne.s32.totalorder %s2413_s15, %s3045_s5  ;;  %p3051_p6 = scmp.lt.s32.totalorder %s3045_s5, %s3045_s5 }
0x19c2   :  { %2405 = vst.msk [vmem:[#allocation9] sm:$0x3] %vm2404_vm12, %v2402_v2 }
0x19c3   :  { %p3052_p7 = por %p3051_p6, %p3050_p5 }
0x19c5   :  { %p3053_p8 = pnand %p3052_p7, %p3046_p4 }
0x19c7   :  { %3056 = shalt.err (!%p3053_p8)
}
0x19c8   :  { %s3057_s0 = scalar_lea.hbm %s3656_s8, 32 }
0x19c9   :  { %p3058_p9 = scmp.ne.s32.totalorder %s3656_s8, %s3057_s0  ;;  %p3061_p10 = scmp.lt.u32.totalorder %s3057_s0, %s3656_s8 }
0x19cb   :  { %p3063_p11 = pnand %p3061_p10, %p3058_p9 }
0x19cd   :  { %3066 = shalt.err (!%p3063_p11)
}
0x19ce   :  { %2415 = dma.vmem_to_hbm [thread:$0]  %s2413_s15, 32, %s3656_s8, [#allocation6]  }
0x19cf   :  { %3071 = dma.done.wait [#allocation6], 32  }
0x19d0   :  { %3072 = vsyncadd [#allocation6], 4294967264 }
0x19d1   :  { %3073 = dma.done.wait [#allocation11], 128  }
0x19d2   :  { %3074 = vsyncadd [#allocation11], 4294967168 }
0x19d3   :  { %2449 = vsyncpa [#allocation5], 1 }
0x19d4   :  { %2450 = vsyncpa [#allocation8], 1 }
0x19d5   :  { %2451 = vsyncpa [#allocation6], 1 }
0x19d6   :  { %2452 = vsyncpa [#allocation11], 1 }

</bundles_post_ra>
